<compile_context>
chip_gen: v5e
topology: v5e:2x2
jax: 0.10.0
libtpu: 0.0.40
codegen_flags: <defaults>
</compile_context>

<pallas_src>
import math

import jax
import jax.numpy as jnp
from jax.experimental import pallas as pl
from jax.experimental.pallas import tpu as pltpu

C1, C2 = 7, 49  # module defaults

# Fixed 2x2 complex oriented filter sign patterns over the block values
# [a, b, c, d] = [x(2i,2j), x(2i,2j+1), x(2i+1,2j), x(2i+1,2j+1)].
# The 0.5 coefficient magnitude is folded into the 1x1-mix weights host-side
# (|0.5*z| = 0.5*|z|), so only signs remain -> pure add/sub chains on the VPU.
_SIGN_RE = ((1, -1, 1, -1), (1, -1, -1, 1), (1, 1, -1, -1),
            (1, -1, 1, -1), (1, -1, -1, 1), (1, 1, -1, -1))
_SIGN_IM = ((1, 1, -1, -1), (1, -1, 1, -1), (1, -1, -1, 1),
            (-1, -1, 1, 1), (-1, 1, -1, 1), (-1, 1, 1, -1))


def _signed_sum(vals, signs):
    acc = vals[0] if signs[0] > 0 else -vals[0]
    for v, s in zip(vals[1:], signs[1:]):
        acc = acc + v if s > 0 else acc - v
    return acc


# ----------------------------------------------------------------------------
# Kernel 1: fused invariant layer (transposed / lane-dense layout)
#   x_ref : (4*Cin, TM)        quadrant-major rows, positions on lanes
#   w_ref : (Cout, 7*Cin + 1)  pre-scaled weights, bias folded as last column
#   o_ref : (Cout, TM)
# ----------------------------------------------------------------------------
def _invariant_layer_kernel(x_ref, w_ref, o_ref):
    cin = x_ref.shape[0] // 4
    tm = x_ref.shape[1]
    a = x_ref[0 * cin:1 * cin, :]
    b = x_ref[1 * cin:2 * cin, :]
    c = x_ref[2 * cin:3 * cin, :]
    d = x_ref[3 * cin:4 * cin, :]
    feats = [a + b + c + d]                            # lowpass (x0.25 in weights)
    for o in range(6):
        re = _signed_sum((a, b, c, d), _SIGN_RE[o])
        im = _signed_sum((a, b, c, d), _SIGN_IM[o])
        feats.append(jnp.sqrt(re * re + im * im))      # |bandpass| (x0.5 in weights)
    feats.append(jnp.ones((1, tm), jnp.float32))       # bias row
    f = jnp.concatenate(feats, axis=0)                 # (7*Cin + 1, TM), sublane stack
    o_ref[...] = jnp.dot(w_ref[...], f, preferred_element_type=jnp.float32)


def invariant_layer(x4, w_aug, *, tm=256):
    """x4: (4*Cin, M) deinterleaved input (positions on lanes).
    w_aug: (Cout, 7*Cin + 1) pre-scaled weights + bias column.
    Returns (Cout, M)."""
    four_cin, m = x4.shape
    cout, kk = w_aug.shape
    m_pad = pl.cdiv(m, tm) * tm
    if m_pad != m:
        x4 = jnp.pad(x4, ((0, 0), (0, m_pad - m)))
    out = pl.pallas_call(
        _invariant_layer_kernel,
        out_shape=jax.ShapeDtypeStruct((cout, m_pad), jnp.float32),
        grid=(m_pad // tm,),
        in_specs=[pl.BlockSpec((four_cin, tm), lambda i: (0, i)),
                  pl.BlockSpec((cout, kk), lambda i: (0, 0))],   # resident weights
        out_specs=pl.BlockSpec((cout, tm), lambda i: (0, i)),    # lane-dense stores
        compiler_params=pltpu.CompilerParams(
            dimension_semantics=("parallel",)),
    )(x4, w_aug)
    return out if m_pad == m else out[:, :m]


# ----------------------------------------------------------------------------
# Host-side 2x2 deinterleave prep (one reshape+transpose, one array, one DMA
# stream per layer; batch kept innermost along the column/lane axis).
# ----------------------------------------------------------------------------
def deinterleave_nchw(x):
    """(N, C, H, W) -> (4*C, (H//2)*(W//2)*N); rows = [a_ch.., b.., c.., d..],
    column = (i2*(W//2) + j2)*N + n."""
    n, c, h, w = x.shape
    ho, wo = h // 2, w // 2
    y = x.reshape(n, c, ho, 2, wo, 2)
    y = jnp.transpose(y, (3, 5, 1, 2, 4, 0))   # (di, dj, C, Ho, Wo, N)
    return y.reshape(4 * c, ho * wo * n)


def deinterleave_cm(y, n, ho, wo):
    """(C, Ho*Wo*N) with batch-innermost columns -> (4*C, (Ho//2)*(Wo//2)*N)."""
    c = y.shape[0]
    h2, w2 = ho // 2, wo // 2
    z = y.reshape(c, h2, 2, w2, 2, n)
    z = jnp.transpose(z, (2, 4, 0, 1, 3, 5))   # (di, dj, C, H2, W2, N)
    return z.reshape(4 * c, h2 * w2 * n)


# ----------------------------------------------------------------------------
# Kernel 2: head  fc1 -> relu -> fc2 -> log_softmax, batch blocked on lanes.
#   x_ref : (7*7*C2, TN)  torch .view flatten order on sublanes, batch on lanes
# ----------------------------------------------------------------------------
def _head_kernel(x_ref, w1_ref, b1_ref, w2_ref, b2_ref, o_ref):
    h = jnp.dot(w1_ref[...], x_ref[...], preferred_element_type=jnp.float32)
    h = jnp.maximum(h + b1_ref[...], 0.0)                        # relu(fc1)
    y = jnp.dot(w2_ref[...], h, preferred_element_type=jnp.float32) + b2_ref[...]
    z = y - jnp.max(y, axis=0, keepdims=True)                    # log_softmax (classes)
    lse = jnp.log(jnp.sum(jnp.exp(z), axis=0, keepdims=True))
    o_ref[...] = z - lse


def head(xT, w1, b1, w2, b2, *, tn=128):
    """xT: (7*7*C2, N). Returns (N, 10) log-probs."""
    k1, n = xT.shape
    n_pad = pl.cdiv(n, tn) * tn
    if n_pad != n:
        xT = jnp.pad(xT, ((0, 0), (0, n_pad - n)))
    out = pl.pallas_call(
        _head_kernel,
        out_shape=jax.ShapeDtypeStruct((10, n_pad), jnp.float32),
        grid=(n_pad // tn,),
        in_specs=[pl.BlockSpec((k1, tn), lambda i: (0, i)),
                  pl.BlockSpec(w1.shape, lambda i: (0, 0)),
                  pl.BlockSpec(b1.shape, lambda i: (0, 0)),
                  pl.BlockSpec(w2.shape, lambda i: (0, 0)),
                  pl.BlockSpec(b2.shape, lambda i: (0, 0))],
        out_specs=pl.BlockSpec((10, tn), lambda i: (0, i)),
        compiler_params=pltpu.CompilerParams(
            dimension_semantics=("parallel",)),
    )(xT, w1, b1, w2, b2)
    return out[:, :n].T


# ----------------------------------------------------------------------------
# Parameters + full forward
# ----------------------------------------------------------------------------
def init_params(key):
    k1, k2, k3, k4, k5, k6 = jax.random.split(key, 6)

    def u(k, shape, fan_in):
        bound = 1.0 / math.sqrt(fan_in)
        return jax.random.uniform(k, shape, jnp.float32, -bound, bound)

    def inv_weights(kw, kb, cin, cout):
        w = u(kw, (cout, 7 * cin), 7 * cin)      # learned 1x1 mix (Cout, 7*Cin)
        b = u(kb, (cout, 1), 7 * cin)
        # Fold the fixed lowpass(0.25)/bandpass(0.5) scales and bias into w.
        scale = jnp.concatenate(
            [jnp.full((1, cin), 0.25, jnp.float32),
             jnp.full((1, 6 * cin), 0.5, jnp.float32)], axis=1)
        return jnp.concatenate([w * scale, b], axis=1)   # (Cout, 7*Cin + 1)

    return {
        "w_c1": inv_weights(k1, k2, 1, C1),        # (C1, 8)
        "w_c2": inv_weights(k3, k4, C1, C2),       # (C2, 50)
        # fc1: 7*7*C2 -> 10 (frozen; bias zeroed as in the module), fc2: 10 -> 10
        "w_fc1": u(k5, (10, 7 * 7 * C2), 7 * 7 * C2),   # torch (out, in) layout
        "b_fc1": jnp.zeros((10, 1), jnp.float32),
        "w_fc2": u(k6, (10, 10), 10),
        "b_fc2": jnp.full((10, 1), 0.01, jnp.float32),
    }


@jax.jit
def invnet_forward(x, params):
    n = x.shape[0]
    x1 = deinterleave_nchw(x)                          # (4, 14*14*N)
    y1 = invariant_layer(x1, params["w_c1"])           # (C1, 14*14*N)
    x2 = deinterleave_cm(y1, n, 14, 14)                # (4*C1, 7*7*N)
    y2 = invariant_layer(x2, params["w_c2"])           # (C2, 7*7*N)
    xT = y2.reshape(7 * 7 * C2, n)    # == torch .view(N, -1), transposed, zero-copy
    return head(xT, params["w_fc1"], params["b_fc1"],
                params["w_fc2"], params["b_fc2"])      # (N, 10) log-probs


if __name__ == "__main__":
    key = jax.random.PRNGKey(0)
    kx, kp = jax.random.split(key)
    params = init_params(kp)
    # MNIST-shaped input (batch=2, 1 channel, 28x28) -> fc1 sees 7*7*C2 = 2401.
    x = jax.random.normal(kx, (2, 1, 28, 28), dtype=jnp.float32)
    out = invnet_forward(x, params)
    out = jax.block_until_ready(out)
    assert out.shape == (2, 10)
    assert bool(jnp.all(jnp.isfinite(out)))
    # rows of log_softmax must sum to ~1 in prob space
    assert bool(jnp.all(jnp.abs(jnp.sum(jnp.exp(out), axis=1) - 1.0) < 1e-4))
    print("KERNEL_OK")
</pallas_src>

<mosaic_0001>
module attributes {stable_mosaic.version = 11 : i64} {
  func.func @_invariant_layer_kernel(%arg0: i32, %arg1: memref<4x256xf32, #tpu.memory_space<vmem>>, %arg2: memref<7x8xf32, #tpu.memory_space<vmem>>, %arg3: memref<7x256xf32, #tpu.memory_space<vmem>>) attributes {dimension_semantics = [#tpu.dimension_semantics<parallel>], iteration_bounds = array<i64: 2>, scalar_prefetch = 0 : i64, scratch_operands = 0 : i64, tpu.core_type = #tpu.core_type<tc>, window_params = [{transform_indices = @transform_0, window_bounds = array<i64: 4, 256>}, {pipeline_mode = #tpu.pipeline_mode<synchronous>, transform_indices = @transform_1, window_bounds = array<i64: 7, 8>}, {transform_indices = @transform_2, window_bounds = array<i64: 7, 256>}]} {
    %c0 = arith.constant 0 : index
    %c0_0 = arith.constant 0 : index
    %0 = vector.load %arg1[%c0, %c0_0] : memref<4x256xf32, #tpu.memory_space<vmem>>, vector<1x256xf32>
    %c1 = arith.constant 1 : index
    %c0_1 = arith.constant 0 : index
    %1 = vector.load %arg1[%c1, %c0_1] : memref<4x256xf32, #tpu.memory_space<vmem>>, vector<1x256xf32>
    %c2 = arith.constant 2 : index
    %c0_2 = arith.constant 0 : index
    %2 = vector.load %arg1[%c2, %c0_2] : memref<4x256xf32, #tpu.memory_space<vmem>>, vector<1x256xf32>
    %c3 = arith.constant 3 : index
    %c0_3 = arith.constant 0 : index
    %3 = vector.load %arg1[%c3, %c0_3] : memref<4x256xf32, #tpu.memory_space<vmem>>, vector<1x256xf32>
    %4 = arith.addf %0, %1 : vector<1x256xf32>
    %5 = arith.addf %4, %2 : vector<1x256xf32>
    %6 = arith.addf %5, %3 : vector<1x256xf32>
    %7 = arith.subf %0, %1 : vector<1x256xf32>
    %8 = arith.addf %7, %2 : vector<1x256xf32>
    %9 = arith.subf %8, %3 : vector<1x256xf32>
    %10 = arith.addf %0, %1 : vector<1x256xf32>
    %11 = arith.subf %10, %2 : vector<1x256xf32>
    %12 = arith.subf %11, %3 : vector<1x256xf32>
    %13 = arith.mulf %9, %9 : vector<1x256xf32>
    %14 = arith.mulf %12, %12 : vector<1x256xf32>
    %15 = arith.addf %13, %14 : vector<1x256xf32>
    %16 = math.sqrt %15 : vector<1x256xf32>
    %17 = arith.subf %0, %1 : vector<1x256xf32>
    %18 = arith.subf %17, %2 : vector<1x256xf32>
    %19 = arith.addf %18, %3 : vector<1x256xf32>
    %20 = arith.subf %0, %1 : vector<1x256xf32>
    %21 = arith.addf %20, %2 : vector<1x256xf32>
    %22 = arith.subf %21, %3 : vector<1x256xf32>
    %23 = arith.mulf %19, %19 : vector<1x256xf32>
    %24 = arith.mulf %22, %22 : vector<1x256xf32>
    %25 = arith.addf %23, %24 : vector<1x256xf32>
    %26 = math.sqrt %25 : vector<1x256xf32>
    %27 = arith.addf %0, %1 : vector<1x256xf32>
    %28 = arith.subf %27, %2 : vector<1x256xf32>
    %29 = arith.subf %28, %3 : vector<1x256xf32>
    %30 = arith.subf %0, %1 : vector<1x256xf32>
    %31 = arith.subf %30, %2 : vector<1x256xf32>
    %32 = arith.addf %31, %3 : vector<1x256xf32>
    %33 = arith.mulf %29, %29 : vector<1x256xf32>
    %34 = arith.mulf %32, %32 : vector<1x256xf32>
    %35 = arith.addf %33, %34 : vector<1x256xf32>
    %36 = math.sqrt %35 : vector<1x256xf32>
    %37 = arith.subf %0, %1 : vector<1x256xf32>
    %38 = arith.addf %37, %2 : vector<1x256xf32>
    %39 = arith.subf %38, %3 : vector<1x256xf32>
    %cst = arith.constant 0.000000e+00 : f32
    %40 = vector.broadcast %cst : f32 to vector<1x256xf32>
    %41 = arith.subf %40, %0 : vector<1x256xf32>
    %42 = arith.subf %41, %1 : vector<1x256xf32>
    %43 = arith.addf %42, %2 : vector<1x256xf32>
    %44 = arith.addf %43, %3 : vector<1x256xf32>
    %45 = arith.mulf %39, %39 : vector<1x256xf32>
    %46 = arith.mulf %44, %44 : vector<1x256xf32>
    %47 = arith.addf %45, %46 : vector<1x256xf32>
    %48 = math.sqrt %47 : vector<1x256xf32>
    %49 = arith.subf %0, %1 : vector<1x256xf32>
    %50 = arith.subf %49, %2 : vector<1x256xf32>
    %51 = arith.addf %50, %3 : vector<1x256xf32>
    %cst_4 = arith.constant 0.000000e+00 : f32
    %52 = vector.broadcast %cst_4 : f32 to vector<1x256xf32>
    %53 = arith.subf %52, %0 : vector<1x256xf32>
    %54 = arith.addf %53, %1 : vector<1x256xf32>
    %55 = arith.subf %54, %2 : vector<1x256xf32>
    %56 = arith.addf %55, %3 : vector<1x256xf32>
    %57 = arith.mulf %51, %51 : vector<1x256xf32>
    %58 = arith.mulf %56, %56 : vector<1x256xf32>
    %59 = arith.addf %57, %58 : vector<1x256xf32>
    %60 = math.sqrt %59 : vector<1x256xf32>
    %61 = arith.addf %0, %1 : vector<1x256xf32>
    %62 = arith.subf %61, %2 : vector<1x256xf32>
    %63 = arith.subf %62, %3 : vector<1x256xf32>
    %cst_5 = arith.constant 0.000000e+00 : f32
    %64 = vector.broadcast %cst_5 : f32 to vector<1x256xf32>
    %65 = arith.subf %64, %0 : vector<1x256xf32>
    %66 = arith.addf %65, %1 : vector<1x256xf32>
    %67 = arith.addf %66, %2 : vector<1x256xf32>
    %68 = arith.subf %67, %3 : vector<1x256xf32>
    %69 = arith.mulf %63, %63 : vector<1x256xf32>
    %70 = arith.mulf %68, %68 : vector<1x256xf32>
    %71 = arith.addf %69, %70 : vector<1x256xf32>
    %72 = math.sqrt %71 : vector<1x256xf32>
    %cst_6 = arith.constant 1.000000e+00 : f32
    %73 = vector.broadcast %cst_6 : f32 to vector<1x256xf32>
    %74 = tpu.concatenate %6, %16, %26, %36, %48, %60, %72, %73 in 0 : vector<1x256xf32>, vector<1x256xf32>, vector<1x256xf32>, vector<1x256xf32>, vector<1x256xf32>, vector<1x256xf32>, vector<1x256xf32>, vector<1x256xf32> -> vector<8x256xf32>
    %c0_7 = arith.constant 0 : index
    %c0_8 = arith.constant 0 : index
    %75 = vector.load %arg2[%c0_7, %c0_8] : memref<7x8xf32, #tpu.memory_space<vmem>>, vector<7x8xf32>
    %cst_9 = arith.constant dense<0.000000e+00> : vector<7x256xf32>
    %76 = tpu.matmul %75, %74, %cst_9 {dimension_numbers = #tpu.dot_dimension_numbers<[1], [0], [0], [1], [0, 0, 1, 1], [], []>} : vector<7x8xf32>, vector<8x256xf32>, vector<7x256xf32> -> vector<7x256xf32>
    %c0_10 = arith.constant 0 : index
    %c0_11 = arith.constant 0 : index
    %77 = vector.load %arg3[%c0_10, %c0_11] : memref<7x256xf32, #tpu.memory_space<vmem>>, vector<7x256xf32>
    tpu.vector_store %arg3[%c0_10, %c0_11], %76 {strides = array<i32>} : memref<7x256xf32, #tpu.memory_space<vmem>>, vector<7x256xf32>,
    return
  }
  func.func @transform_0(%arg0: i32) -> (i32, i32) {
    %c0_i32 = arith.constant 0 : i32
    %c0_i32_0 = arith.constant 0 : i32
    return %c0_i32, %arg0 : i32, i32
  }
  func.func @transform_1(%arg0: i32) -> (i32, i32) {
    %c0_i32 = arith.constant 0 : i32
    %c0_i32_0 = arith.constant 0 : i32
    %c0_i32_1 = arith.constant 0 : i32
    return %c0_i32, %c0_i32_0 : i32, i32
  }
  func.func @transform_2(%arg0: i32) -> (i32, i32) {
    %c0_i32 = arith.constant 0 : i32
    %c0_i32_0 = arith.constant 0 : i32
    return %c0_i32, %arg0 : i32, i32
  }
}

module attributes {stable_mosaic.version = 11 : i64} {
  func.func @_invariant_layer_kernel(%arg0: i32, %arg1: memref<28x256xf32, #tpu.memory_space<vmem>>, %arg2: memref<49x50xf32, #tpu.memory_space<vmem>>, %arg3: memref<49x256xf32, #tpu.memory_space<vmem>>) attributes {dimension_semantics = [#tpu.dimension_semantics<parallel>], iteration_bounds = array<i64: 1>, scalar_prefetch = 0 : i64, scratch_operands = 0 : i64, tpu.core_type = #tpu.core_type<tc>, window_params = [{transform_indices = @transform_0, window_bounds = array<i64: 28, 256>}, {pipeline_mode = #tpu.pipeline_mode<synchronous>, transform_indices = @transform_1, window_bounds = array<i64: 49, 50>}, {transform_indices = @transform_2, window_bounds = array<i64: 49, 256>}]} {
    %c0 = arith.constant 0 : index
    %c0_0 = arith.constant 0 : index
    %0 = vector.load %arg1[%c0, %c0_0] : memref<28x256xf32, #tpu.memory_space<vmem>>, vector<7x256xf32>
    %c7 = arith.constant 7 : index
    %c0_1 = arith.constant 0 : index
    %1 = vector.load %arg1[%c7, %c0_1] : memref<28x256xf32, #tpu.memory_space<vmem>>, vector<7x256xf32>
    %c14 = arith.constant 14 : index
    %c0_2 = arith.constant 0 : index
    %2 = vector.load %arg1[%c14, %c0_2] : memref<28x256xf32, #tpu.memory_space<vmem>>, vector<7x256xf32>
    %c21 = arith.constant 21 : index
    %c0_3 = arith.constant 0 : index
    %3 = vector.load %arg1[%c21, %c0_3] : memref<28x256xf32, #tpu.memory_space<vmem>>, vector<7x256xf32>
    %4 = arith.addf %0, %1 : vector<7x256xf32>
    %5 = arith.addf %4, %2 : vector<7x256xf32>
    %6 = arith.addf %5, %3 : vector<7x256xf32>
    %7 = arith.subf %0, %1 : vector<7x256xf32>
    %8 = arith.addf %7, %2 : vector<7x256xf32>
    %9 = arith.subf %8, %3 : vector<7x256xf32>
    %10 = arith.addf %0, %1 : vector<7x256xf32>
    %11 = arith.subf %10, %2 : vector<7x256xf32>
    %12 = arith.subf %11, %3 : vector<7x256xf32>
    %13 = arith.mulf %9, %9 : vector<7x256xf32>
    %14 = arith.mulf %12, %12 : vector<7x256xf32>
    %15 = arith.addf %13, %14 : vector<7x256xf32>
    %16 = math.sqrt %15 : vector<7x256xf32>
    %17 = arith.subf %0, %1 : vector<7x256xf32>
    %18 = arith.subf %17, %2 : vector<7x256xf32>
    %19 = arith.addf %18, %3 : vector<7x256xf32>
    %20 = arith.subf %0, %1 : vector<7x256xf32>
    %21 = arith.addf %20, %2 : vector<7x256xf32>
    %22 = arith.subf %21, %3 : vector<7x256xf32>
    %23 = arith.mulf %19, %19 : vector<7x256xf32>
    %24 = arith.mulf %22, %22 : vector<7x256xf32>
    %25 = arith.addf %23, %24 : vector<7x256xf32>
    %26 = math.sqrt %25 : vector<7x256xf32>
    %27 = arith.addf %0, %1 : vector<7x256xf32>
    %28 = arith.subf %27, %2 : vector<7x256xf32>
    %29 = arith.subf %28, %3 : vector<7x256xf32>
    %30 = arith.subf %0, %1 : vector<7x256xf32>
    %31 = arith.subf %30, %2 : vector<7x256xf32>
    %32 = arith.addf %31, %3 : vector<7x256xf32>
    %33 = arith.mulf %29, %29 : vector<7x256xf32>
    %34 = arith.mulf %32, %32 : vector<7x256xf32>
    %35 = arith.addf %33, %34 : vector<7x256xf32>
    %36 = math.sqrt %35 : vector<7x256xf32>
    %37 = arith.subf %0, %1 : vector<7x256xf32>
    %38 = arith.addf %37, %2 : vector<7x256xf32>
    %39 = arith.subf %38, %3 : vector<7x256xf32>
    %cst = arith.constant 0.000000e+00 : f32
    %40 = vector.broadcast %cst : f32 to vector<7x256xf32>
    %41 = arith.subf %40, %0 : vector<7x256xf32>
    %42 = arith.subf %41, %1 : vector<7x256xf32>
    %43 = arith.addf %42, %2 : vector<7x256xf32>
    %44 = arith.addf %43, %3 : vector<7x256xf32>
    %45 = arith.mulf %39, %39 : vector<7x256xf32>
    %46 = arith.mulf %44, %44 : vector<7x256xf32>
    %47 = arith.addf %45, %46 : vector<7x256xf32>
    %48 = math.sqrt %47 : vector<7x256xf32>
    %49 = arith.subf %0, %1 : vector<7x256xf32>
    %50 = arith.subf %49, %2 : vector<7x256xf32>
    %51 = arith.addf %50, %3 : vector<7x256xf32>
    %cst_4 = arith.constant 0.000000e+00 : f32
    %52 = vector.broadcast %cst_4 : f32 to vector<7x256xf32>
    %53 = arith.subf %52, %0 : vector<7x256xf32>
    %54 = arith.addf %53, %1 : vector<7x256xf32>
    %55 = arith.subf %54, %2 : vector<7x256xf32>
    %56 = arith.addf %55, %3 : vector<7x256xf32>
    %57 = arith.mulf %51, %51 : vector<7x256xf32>
    %58 = arith.mulf %56, %56 : vector<7x256xf32>
    %59 = arith.addf %57, %58 : vector<7x256xf32>
    %60 = math.sqrt %59 : vector<7x256xf32>
    %61 = arith.addf %0, %1 : vector<7x256xf32>
    %62 = arith.subf %61, %2 : vector<7x256xf32>
    %63 = arith.subf %62, %3 : vector<7x256xf32>
    %cst_5 = arith.constant 0.000000e+00 : f32
    %64 = vector.broadcast %cst_5 : f32 to vector<7x256xf32>
    %65 = arith.subf %64, %0 : vector<7x256xf32>
    %66 = arith.addf %65, %1 : vector<7x256xf32>
    %67 = arith.addf %66, %2 : vector<7x256xf32>
    %68 = arith.subf %67, %3 : vector<7x256xf32>
    %69 = arith.mulf %63, %63 : vector<7x256xf32>
    %70 = arith.mulf %68, %68 : vector<7x256xf32>
    %71 = arith.addf %69, %70 : vector<7x256xf32>
    %72 = math.sqrt %71 : vector<7x256xf32>
    %cst_6 = arith.constant 1.000000e+00 : f32
    %73 = vector.broadcast %cst_6 : f32 to vector<1x256xf32>
    %74 = tpu.concatenate %6, %16, %26, %36, %48, %60, %72, %73 in 0 : vector<7x256xf32>, vector<7x256xf32>, vector<7x256xf32>, vector<7x256xf32>, vector<7x256xf32>, vector<7x256xf32>, vector<7x256xf32>, vector<1x256xf32> -> vector<50x256xf32>
    %c0_7 = arith.constant 0 : index
    %c0_8 = arith.constant 0 : index
    %75 = vector.load %arg2[%c0_7, %c0_8] : memref<49x50xf32, #tpu.memory_space<vmem>>, vector<49x50xf32>
    %cst_9 = arith.constant dense<0.000000e+00> : vector<49x256xf32>
    %76 = tpu.matmul %75, %74, %cst_9 {dimension_numbers = #tpu.dot_dimension_numbers<[1], [0], [0], [1], [0, 0, 1, 1], [], []>} : vector<49x50xf32>, vector<50x256xf32>, vector<49x256xf32> -> vector<49x256xf32>
    %c0_10 = arith.constant 0 : index
    %c0_11 = arith.constant 0 : index
    %77 = vector.load %arg3[%c0_10, %c0_11] : memref<49x256xf32, #tpu.memory_space<vmem>>, vector<49x256xf32>
    tpu.vector_store %arg3[%c0_10, %c0_11], %76 {strides = array<i32>} : memref<49x256xf32, #tpu.memory_space<vmem>>, vector<49x256xf32>,
    return
  }
  func.func @transform_0(%arg0: i32) -> (i32, i32) {
    %c0_i32 = arith.constant 0 : i32
    %c0_i32_0 = arith.constant 0 : i32
    return %c0_i32, %arg0 : i32, i32
  }
  func.func @transform_1(%arg0: i32) -> (i32, i32) {
    %c0_i32 = arith.constant 0 : i32
    %c0_i32_0 = arith.constant 0 : i32
    %c0_i32_1 = arith.constant 0 : i32
    return %c0_i32, %c0_i32_0 : i32, i32
  }
  func.func @transform_2(%arg0: i32) -> (i32, i32) {
    %c0_i32 = arith.constant 0 : i32
    %c0_i32_0 = arith.constant 0 : i32
    return %c0_i32, %arg0 : i32, i32
  }
}

module attributes {stable_mosaic.version = 11 : i64} {
  func.func @_head_kernel(%arg0: i32, %arg1: memref<2401x128xf32, #tpu.memory_space<vmem>>, %arg2: memref<10x2401xf32, #tpu.memory_space<vmem>>, %arg3: memref<10x1xf32, #tpu.memory_space<vmem>>, %arg4: memref<10x10xf32, #tpu.memory_space<vmem>>, %arg5: memref<10x1xf32, #tpu.memory_space<vmem>>, %arg6: memref<10x128xf32, #tpu.memory_space<vmem>>) attributes {dimension_semantics = [#tpu.dimension_semantics<parallel>], iteration_bounds = array<i64: 1>, scalar_prefetch = 0 : i64, scratch_operands = 0 : i64, tpu.core_type = #tpu.core_type<tc>, window_params = [{transform_indices = @transform_0, window_bounds = array<i64: 2401, 128>}, {pipeline_mode = #tpu.pipeline_mode<synchronous>, transform_indices = @transform_1, window_bounds = array<i64: 10, 2401>}, {pipeline_mode = #tpu.pipeline_mode<synchronous>, transform_indices = @transform_2, window_bounds = array<i64: 10, 1>}, {pipeline_mode = #tpu.pipeline_mode<synchronous>, transform_indices = @transform_3, window_bounds = array<i64: 10, 10>}, {pipeline_mode = #tpu.pipeline_mode<synchronous>, transform_indices = @transform_4, window_bounds = array<i64: 10, 1>}, {transform_indices = @transform_5, window_bounds = array<i64: 10, 128>}]} {
    %c0 = arith.constant 0 : index
    %c0_0 = arith.constant 0 : index
    %0 = vector.load %arg2[%c0, %c0_0] : memref<10x2401xf32, #tpu.memory_space<vmem>>, vector<10x2401xf32>
    %c0_1 = arith.constant 0 : index
    %c0_2 = arith.constant 0 : index
    %1 = vector.load %arg1[%c0_1, %c0_2] : memref<2401x128xf32, #tpu.memory_space<vmem>>, vector<2401x128xf32>
    %cst = arith.constant dense<0.000000e+00> : vector<10x128xf32>
    %2 = tpu.matmul %0, %1, %cst {dimension_numbers = #tpu.dot_dimension_numbers<[1], [0], [0], [1], [0, 0, 1, 1], [], []>} : vector<10x2401xf32>, vector<2401x128xf32>, vector<10x128xf32> -> vector<10x128xf32>
    %c0_3 = arith.constant 0 : index
    %c0_4 = arith.constant 0 : index
    %3 = vector.load %arg3[%c0_3, %c0_4] : memref<10x1xf32, #tpu.memory_space<vmem>>, vector<10x1xf32>
    %4 = vector.broadcast %3 : vector<10x1xf32> to vector<10x128xf32>
    %5 = arith.addf %2, %4 : vector<10x128xf32>
    %cst_5 = arith.constant 0.000000e+00 : f32
    %6 = vector.broadcast %cst_5 : f32 to vector<10x128xf32>
    %7 = arith.maximumf %5, %6 : vector<10x128xf32>
    %c0_6 = arith.constant 0 : index
    %c0_7 = arith.constant 0 : index
    %8 = vector.load %arg4[%c0_6, %c0_7] : memref<10x10xf32, #tpu.memory_space<vmem>>, vector<10x10xf32>
    %cst_8 = arith.constant dense<0.000000e+00> : vector<10x128xf32>
    %9 = tpu.matmul %8, %7, %cst_8 {dimension_numbers = #tpu.dot_dimension_numbers<[1], [0], [0], [1], [0, 0, 1, 1], [], []>} : vector<10x10xf32>, vector<10x128xf32>, vector<10x128xf32> -> vector<10x128xf32>
    %c0_9 = arith.constant 0 : index
    %c0_10 = arith.constant 0 : index
    %10 = vector.load %arg5[%c0_9, %c0_10] : memref<10x1xf32, #tpu.memory_space<vmem>>, vector<10x1xf32>
    %11 = vector.broadcast %10 : vector<10x1xf32> to vector<10x128xf32>
    %12 = arith.addf %9, %11 : vector<10x128xf32>
    %cst_11 = arith.constant dense<0xFF800000> : vector<128xf32>
    %13 = vector.multi_reduction <maximumf>, %12, %cst_11 [0] : vector<10x128xf32> to vector<128xf32>
    %14 = vector.shape_cast %13 : vector<128xf32> to vector<1x128xf32>
    %15 = vector.broadcast %14 : vector<1x128xf32> to vector<10x128xf32>
    %16 = arith.subf %12, %15 : vector<10x128xf32>
    %17 = math.exp %16 : vector<10x128xf32>
    %cst_12 = arith.constant dense<0.000000e+00> : vector<128xf32>
    %18 = vector.multi_reduction <add>, %17, %cst_12 [0] : vector<10x128xf32> to vector<128xf32>
    %19 = vector.shape_cast %18 : vector<128xf32> to vector<1x128xf32>
    %20 = math.log %19 : vector<1x128xf32>
    %21 = vector.broadcast %20 : vector<1x128xf32> to vector<10x128xf32>
    %22 = arith.subf %16, %21 : vector<10x128xf32>
    %c0_13 = arith.constant 0 : index
    %c0_14 = arith.constant 0 : index
    %23 = vector.load %arg6[%c0_13, %c0_14] : memref<10x128xf32, #tpu.memory_space<vmem>>, vector<10x128xf32>
    tpu.vector_store %arg6[%c0_13, %c0_14], %22 {strides = array<i32>} : memref<10x128xf32, #tpu.memory_space<vmem>>, vector<10x128xf32>,
    return
  }
  func.func @transform_0(%arg0: i32) -> (i32, i32) {
    %c0_i32 = arith.constant 0 : i32
    %c0_i32_0 = arith.constant 0 : i32
    return %c0_i32, %arg0 : i32, i32
  }
  func.func @transform_1(%arg0: i32) -> (i32, i32) {
    %c0_i32 = arith.constant 0 : i32
    %c0_i32_0 = arith.constant 0 : i32
    %c0_i32_1 = arith.constant 0 : i32
    return %c0_i32, %c0_i32_0 : i32, i32
  }
  func.func @transform_2(%arg0: i32) -> (i32, i32) {
    %c0_i32 = arith.constant 0 : i32
    %c0_i32_0 = arith.constant 0 : i32
    %c0_i32_1 = arith.constant 0 : i32
    return %c0_i32, %c0_i32_0 : i32, i32
  }
  func.func @transform_3(%arg0: i32) -> (i32, i32) {
    %c0_i32 = arith.constant 0 : i32
    %c0_i32_0 = arith.constant 0 : i32
    %c0_i32_1 = arith.constant 0 : i32
    return %c0_i32, %c0_i32_0 : i32, i32
  }
  func.func @transform_4(%arg0: i32) -> (i32, i32) {
    %c0_i32 = arith.constant 0 : i32
    %c0_i32_0 = arith.constant 0 : i32
    %c0_i32_1 = arith.constant 0 : i32
    return %c0_i32, %c0_i32_0 : i32, i32
  }
  func.func @transform_5(%arg0: i32) -> (i32, i32) {
    %c0_i32 = arith.constant 0 : i32
    %c0_i32_0 = arith.constant 0 : i32
    return %c0_i32, %arg0 : i32, i32
  }
}

</mosaic_0001>

<bundles_post_ra>
// kernel: invnet_forward.3
= control target key start
LH: loop header
LB: loop body
LE: loop exit
PB: predicated region body
PF: predicated region fallthrough
CT: control target
= control target key end

     0   :  { %s475_s9 = smov 0   ;;  %s599_s0 = inlined_call_operand.vmem [shape: f32[4,512], index: 0, kind: input, shape index: {}]   ;;  %s600_s1 = inlined_call_operand.vmem [shape: f32[7,8], index: 1, kind: input, shape index: {}]   ;;  %s601_s2 = inlined_call_operand.vmem [shape: f32[7,512], index: 2, kind: output, shape index: {}]  }
   0x1 LB: > { %s416_s10 = sadd.s32 4294967295, %s458_s9   ;;  %p420_p0 = scmp.ge.s32.totalorder %s458_s9, 1  ;;  %s458_s9 = sphi %s475_s9, %s12_s9  }
   0x2   : > { %p113_p1 = scmp.lt.s32.totalorder %s458_s9, 3 }
   0x4   : > { %p114_p2 = pnand %p420_p0, %p113_p1 }
   0x5   : > { %s421_s11 = sshll.u32 (!%p114_p2), %s416_s10, 1 }
   0x6   : > { %117 = sbr.rel (%p114_p2) target bundleno = 187 (0xbb), region = 28  ;;  %p136_p3 = scmp.lt.s32.totalorder (!%p114_p2), %s421_s11, 3 }
   0xb   : > { %s608_s11 = smov (!%p136_p3, %s421_s11), 3  ;;  %vm292_vm6 = vcmask 1040384   ;;  %vm295_vm8 = vcmask 1041408   ;;  %vm301_vm14 = vcmask 1043456   ;;  %vm307_vm12 = vcmask 1045504  }
   0xc   : > { %s422_s12 = sshll.u32 %s608_s11, 2  ;;  %vm310_vm11 = vcmask 1046528   ;;  %s424_s18 = sshll.u32 %s608_s11, 3 }
   0xd   : > { %s139_s15 = scalar_lea.vmem %s599_s0, %s422_s12  ;;  %s145_s21 = scalar_lea.vmem %s601_s2, %s424_s18 }
   0xe   : > { %v147_v0 = vld [vmem:[%s139_s15] ss:$4 sm:$0x3]  ;;  %v425_v1 = vld [vmem:[%s139_s15 + $0x1] ss:$4 sm:$0x3] }
   0xf   : > { %v426_v2 = vld [vmem:[%s139_s15 + $0x2] ss:$4 sm:$0x3]  ;;  %v154_v3 = vadd.f32 %v425_v1, %v147_v0  ;;  %v157_v4 = vsub.f32 %v147_v0, %v425_v1  ;;  %v427_v5 = vld [vmem:[%s139_s15 + $0x3] ss:$4 sm:$0x3] }
  0x10   : > { %v206_v6 = vsub.f32 0.0, %v147_v0 }
  0x11   : > { %v158_v7 = vadd.f32 %v426_v2, %v157_v4  ;;  %v160_v8 = vsub.f32 %v154_v3, %v426_v2  ;;  %v177_v9 = vsub.f32 %v157_v4, %v426_v2  ;;  %v155_v30 = vadd.f32 %v426_v2, %v154_v3 }
  0x12   : > { %v207_v10 = vsub.f32 %v206_v6, %v425_v1  ;;  %v224_v11 = vadd.f32 %v425_v1, %v206_v6 }
  0x13   : > { %v159_v12 = vsub.f32 %v158_v7, %v427_v5  ;;  %v161_v13 = vsub.f32 %v160_v8, %v427_v5  ;;  %v178_v14 = vadd.f32 %v427_v5, %v177_v9  ;;  %v504_v34 = vadd.f32 %v427_v5, %v155_v30 }
  0x14   : > { %v208_v15 = vadd.f32 %v426_v2, %v207_v10  ;;  %v225_v16 = vsub.f32 %v224_v11, %v426_v2  ;;  %v241_v17 = vadd.f32 %v426_v2, %v224_v11 }
  0x15   : > { %v162_v18 = vmul.f32 %v159_v12, %v159_v12  ;;  %v163_v19 = vmul.f32 %v161_v13, %v161_v13  ;;  %v179_v20 = vmul.f32 %v178_v14, %v178_v14  ;;  %v258_v40 = vperm.slane %v504_v34, 0 }
  0x16   : > { %v209_v21 = vadd.f32 %v427_v5, %v208_v15  ;;  %v226_v22 = vadd.f32 %v427_v5, %v225_v16  ;;  %v242_v23 = vsub.f32 %v241_v17, %v427_v5  ;;  %v259_v53 = vperm.slane %v504_v34, 1 }
  0x17   : > { %v489_v24 = vadd.f32 %v163_v19, %v162_v18  ;;  %v491_v25 = vadd.f32 %v179_v20, %v162_v18  ;;  %v493_v26 = vadd.f32 %v179_v20, %v163_v19 }
  0x18   : > { %v210_v27 = vmul.f32 %v209_v21, %v209_v21  ;;  %v227_v28 = vmul.f32 %v226_v22, %v226_v22  ;;  %v243_v29 = vmul.f32 %v242_v23, %v242_v23 }
  0x19   : > { %440 = vrsqrt.f32 %v489_v24  ;;  %vm172_vm0 = vcmp.eq.f32.partialorder %v489_v24, inf  ;;  %vm174_vm1 = vcmp.eq.f32.partialorder %v489_v24, 0.0  ;;  %v175_v42 = vand.u32 2147483648, %v489_v24 }
  0x1a   : > { %442 = vrsqrt.f32 %v491_v25  ;;  %v498_v31 = vadd.f32 %v210_v27, %v162_v18  ;;  %v500_v32 = vadd.f32 %v227_v28, %v179_v20  ;;  %v502_v33 = vadd.f32 %v243_v29, %v163_v19 }
  0x1b   : > { %444 = vrsqrt.f32 %v493_v26  ;;  %vm188_vm2 = vcmp.eq.f32.partialorder %v491_v25, inf  ;;  %vm190_vm3 = vcmp.eq.f32.partialorder %v491_v25, 0.0  ;;  %v191_v45 = vand.u32 2147483648, %v491_v25 }
  0x1c   : > { %446 = vrsqrt.f32 %v498_v31  ;;  %vm201_vm4 = vcmp.eq.f32.partialorder %v493_v26, inf  ;;  %vm203_vm5 = vcmp.eq.f32.partialorder %v493_v26, 0.0  ;;  %v204_v51 = vand.u32 2147483648, %v493_v26 }
  0x1d   : > { %448 = vrsqrt.f32 %v500_v32  ;;  %vm219_vm7 = vcmp.eq.f32.partialorder %v498_v31, inf  ;;  %v222_v57 = vand.u32 2147483648, %v498_v31  ;;  %vm221_vm9 = vcmp.eq.f32.partialorder %v498_v31, 0.0 }
  0x1e   : > { %450 = vrsqrt.f32 %v502_v33  ;;  %vm236_vm10 = vcmp.eq.f32.partialorder %v500_v32, inf  ;;  %v239_v3 = vand.u32 2147483648, %v500_v32  ;;  %vm252_vm13 = vcmp.eq.f32.partialorder %v502_v33, inf }
  0x1f   : > { %v441_v35 = vpop.eup %440  ;;  %vm254_vm15 = vcmp.eq.f32.partialorder %v502_v33, 0.0  ;;  %v255_v14 = vand.u32 2147483648, %v502_v33 }
  0x20   : > { %v443_v36 = vpop.eup %442  ;;  %v166_v37 = vmul.f32 %v441_v35, %v489_v24 }
  0x21   : > { %v445_v38 = vpop.eup %444  ;;  %v182_v39 = vmul.f32 %v443_v36, %v491_v25 }
  0x22   : > { %v167_v41 = vmul.f32 %v441_v35, %v166_v37  ;;  %v195_v43 = vmul.f32 %v445_v38, %v493_v26  ;;  %v447_v46 = vpop.eup %446 }
  0x23   : > { %v183_v44 = vmul.f32 %v443_v36, %v182_v39  ;;  %v449_v49 = vpop.eup %448  ;;  %v213_v52 = vmul.f32 %v447_v46, %v498_v31 }
  0x24   : > { %v168_v47 = vmul.f32 0.5, %v167_v41  ;;  %v196_v48 = vmul.f32 %v445_v38, %v195_v43  ;;  %v451_v54 = vpop.eup %450  ;;  %v230_v58 = vmul.f32 %v449_v49, %v500_v32 }
  0x25   : > { %v184_v50 = vmul.f32 0.5, %v183_v44  ;;  %v214_v60 = vmul.f32 %v447_v46, %v213_v52  ;;  %v246_v61 = vmul.f32 %v451_v54, %v502_v33 }
  0x26   : > { %v169_v55 = vsub.f32 1.5, %v168_v47  ;;  %v197_v56 = vmul.f32 0.5, %v196_v48  ;;  %v231_v0 = vmul.f32 %v449_v49, %v230_v58 }
  0x27   : > { %v185_v59 = vsub.f32 1.5, %v184_v50  ;;  %v215_v2 = vmul.f32 0.5, %v214_v60  ;;  %v247_v4 = vmul.f32 %v451_v54, %v246_v61 }
  0x28   : > { %v170_v62 = vmul.f32 %v441_v35, %v169_v55  ;;  %v198_v63 = vsub.f32 1.5, %v197_v56  ;;  %v232_v7 = vmul.f32 0.5, %v231_v0  ;;  %v313_v56 = vld [vmem:[%s600_s1] sm:$0x7f] }
  0x29   : > { %v186_v1 = vmul.f32 %v443_v36, %v185_v59  ;;  %v216_v9 = vsub.f32 1.5, %v215_v2  ;;  %v248_v10 = vmul.f32 0.5, %v247_v4 }
  0x2a   : > { %v171_v5 = vmul.f32 %v170_v62, %v489_v24  ;;  %v199_v6 = vmul.f32 %v445_v38, %v198_v63  ;;  %v233_v13 = vsub.f32 1.5, %v232_v7 }
  0x2b   : > { %v187_v8 = vmul.f32 %v186_v1, %v491_v25  ;;  %v217_v17 = vmul.f32 %v447_v46, %v216_v9  ;;  %v249_v18 = vsub.f32 1.5, %v248_v10 }
  0x2c   : > { %v173_v11 = vsel %vm172_vm0, %v489_v24, %v171_v5  ;;  %v200_v12 = vmul.f32 %v199_v6, %v493_v26  ;;  %v234_v21 = vmul.f32 %v449_v49, %v233_v13  ;;  %vm602_vm0 = vcmask 1042432  }
  0x2d   : > { %v176_v15 = vsel %vm174_vm1, %v175_v42, %v173_v11  ;;  %v189_v16 = vsel %vm188_vm2, %v491_v25, %v187_v8  ;;  %v218_v24 = vmul.f32 %v217_v17, %v498_v31  ;;  %v250_v27 = vmul.f32 %v451_v54, %v249_v18 }
  0x2e   : > { %v192_v19 = vsel %vm190_vm3, %v191_v45, %v189_v16  ;;  %v202_v20 = vsel %vm201_vm4, %v493_v26, %v200_v12  ;;  %v263_v22 = vperm.slane %v176_v15, 0  ;;  %v235_v29 = vmul.f32 %v234_v21, %v500_v32  ;;  %vm605_vm3 = vmmov %vm602_vm0 }
  0x2f   : > { %v205_v23 = vsel %vm203_vm5, %v204_v51, %v202_v20  ;;  %v268_v28 = vperm.slane %v192_v19, 0  ;;  %v264_v35 = vperm.slane %v176_v15, 1  ;;  %v220_v36 = vsel %vm219_vm7, %v498_v31, %v218_v24 }
  0x30   : > { %v273_v30 = vperm.slane %v205_v23, 0  ;;  %v293_v25 = vsel %vm292_vm6, %v258_v40, %v263_v22  ;;  %v251_v37 = vmul.f32 %v250_v27, %v502_v33  ;;  %v269_v38 = vperm.slane %v192_v19, 1 }
  0x31   : > { %v296_v26 = vsel %vm295_vm8, %v293_v25, %v268_v28  ;;  %v223_v39 = vsel %vm221_vm9, %v222_v57, %v220_v36  ;;  %v237_v41 = vsel %vm236_vm10, %v500_v32, %v235_v29  ;;  %v274_v40 = vperm.slane %v205_v23, 1 }
  0x32   : > { %v299_v42 = vsel %vm602_vm0, %v296_v26, %v273_v30  ;;  %vm603_vm1 = vcmp.eq.f32.partialorder %v500_v32, 0.0  ;;  %v253_v44 = vsel %vm252_vm13, %v502_v33, %v251_v37  ;;  %v278_v45 = vperm.slane %v223_v39, 0 }
  0x33   : > { %v240_v43 = vsel %vm603_vm1, %v239_v3, %v237_v41  ;;  %v279_v46 = vperm.slane %v223_v39, 1  ;;  %v256_v31 = vsel %vm254_vm15, %v255_v14, %v253_v44  ;;  %v294_v49 = vsel %vm292_vm6, %v259_v53, %v264_v35 }
  0x34   : > { %v283_v47 = vperm.slane %v240_v43, 0  ;;  %v284_v48 = vperm.slane %v240_v43, 1  ;;  %v288_v50 = vperm.slane %v256_v31, 0  ;;  %v302_v51 = vsel %vm301_vm14, %v299_v42, %v278_v45 }
  0x35   : > { %v289_v32 = vperm.slane %v256_v31, 1  ;;  %v297_v52 = vsel %vm295_vm8, %v294_v49, %v269_v38  ;;  %vm604_vm2 = vcmask 1044480   ;;  %vm314_vm4 = vcmask 64512  }
  0x36   : > { %v305_v54 = vsel %vm604_vm2, %v302_v51, %v283_v47  ;;  %v300_v55 = vsel %vm605_vm3, %v297_v52, %v274_v40  ;;  %vm606_vm5 = vmmov %vm604_vm2 }
  0x37   : > { %v308_v33 = vsel %vm307_vm12, %v305_v54, %v288_v50  ;;  %v303_v34 = vsel %vm301_vm14, %v300_v55, %v279_v46 }
  0x38   : > { %v311_v53 = vsel %vm310_vm11, %v308_v33, 1.0  ;;  %v306_v57 = vsel %vm606_vm5, %v303_v34, %v284_v48 }
  0x39   : > { %333 = vmatpush.msra.mxu0 %v311_v53  ;;  %v309_v58 = vsel %vm307_vm12, %v306_v57, %v289_v32 }
  0x3a   : > { %428 = vmatmul.msk.f32.vlgmr.msra.gmra.mxu0 %vm314_vm4, %v313_v56  ;;  %v312_v59 = vsel %vm310_vm11, %v309_v58, 1.0 }
  0x3b   : > { %353 = vmatpush.msra.mxu1 %v312_v59 }
  0x3c   : > { %429 = vmatmul.msk.f32.vlgmr.msra.gmra.mxu1 %vm314_vm4, %v313_v56 }
  0xb7   : > { %v335_v60 = vpop.f32.mrf.mxu0 }
  0xb8   : > { %358 = vst [vmem:[%s145_s21] sm:$0x7f] %v335_v60 }
  0xb9   : > { %v355_v61 = vpop.f32.mrf.mxu1 }
  0xba   : > { %359 = vst [vmem:[%s145_s21 + $0x8] sm:$0x7f] %v355_v61 }
  0xbb PF: > { %s12_s9 = sadd.s32 1, %s458_s9  }
  0xbc   : > { %p9_p4 = scmp.ge.s32.totalorder %s12_s9, 4  }
  0xbe   :  { %11 = sbr.rel (!%p9_p4) target bundleno = 1 (0x1), region = 61 }

// kernel: invnet_forward.4
= control target key start
LH: loop header
LB: loop body
LE: loop exit
PB: predicated region body
PF: predicated region fallthrough
CT: control target
= control target key end

     0   :  { %vm29_vm0 = vcmask 1040384   ;;  %vm44_vm1 = vcmask 1041408   ;;  %vm888_vm2 = vcmask 1042432   ;;  %s885_s0 = inlined_call_operand.vmem [shape: f32[28,256], index: 0, kind: input, shape index: {}]   ;;  %s886_s1 = inlined_call_operand.vmem [shape: f32[49,50], index: 1, kind: input, shape index: {}]   ;;  %s887_s2 = inlined_call_operand.vmem [shape: f32[49,256], index: 2, kind: output, shape index: {}]  }
   0x1   :  { %v13_v0 = vld [vmem:[%s885_s0] sm:$0x80]  ;;  %v14_v1 = vld [vmem:[%s885_s0 + $0x8] sm:$0x80]  ;;  %v15_v2 = vld [vmem:[%s885_s0 + $0x10] sm:$0x3f] }
   0x2   :  { %v16_v3 = vld [vmem:[%s885_s0 + $0x18] sm:$0x3f]  ;;  %v17_v4 = vld [vmem:[%s885_s0 + $0x10] sm:$0xc0]  ;;  %v19_v5 = vld [vmem:[%s885_s0 + $0x20] sm:$0x1f] }
   0x3   :  { %v18_v6 = vld [vmem:[%s885_s0 + $0x18] sm:$0xc0]  ;;  %v20_v7 = vld [vmem:[%s885_s0 + $0x28] sm:$0x1f]  ;;  %v21_v8 = vld [vmem:[%s885_s0 + $0x20] sm:$0xe0] }
   0x4   :  { %v11_v9 = vld [vmem:[%s885_s0] sm:$0x7f]  ;;  %v23_v10 = vld [vmem:[%s885_s0 + $0x30] sm:$0xf]  ;;  %v30_v11 = vrot.slane %v13_v0, 7  ;;  %v31_v12 = vrot.slane %v15_v2, 7 }
   0x5   :  { %v22_v13 = vld [vmem:[%s885_s0 + $0x28] sm:$0xe0]  ;;  %v33_v14 = vrot.slane %v14_v1, 7  ;;  %v34_v15 = vrot.slane %v16_v3, 7  ;;  %v45_v16 = vrot.slane %v17_v4, 6  ;;  %v46_v17 = vrot.slane %v19_v5, 6 }
   0x6   :  { %v24_v18 = vld [vmem:[%s885_s0 + $0x38] sm:$0xf]  ;;  %v32_v19 = vsel %vm29_vm0, %v30_v11, %v31_v12  ;;  %v48_v20 = vrot.slane %v18_v6, 6  ;;  %v49_v21 = vrot.slane %v20_v7, 6  ;;  %v60_v22 = vrot.slane %v21_v8, 5 }
   0x7   :  { %v12_v23 = vld [vmem:[%s885_s0 + $0x8] sm:$0x7f]  ;;  %v35_v24 = vsel %vm29_vm0, %v33_v14, %v34_v15  ;;  %v566_v25 = vadd.f32 %v32_v19, %v11_v9  ;;  %v569_v26 = vsel %vm44_vm1, %v45_v16, %v46_v17  ;;  %v61_v27 = vrot.slane %v23_v10, 5 }
   0x8   :  { %v571_v28 = vadd.f32 %v35_v24, %v12_v23  ;;  %v574_v29 = vsel %vm44_vm1, %v48_v20, %v49_v21  ;;  %v63_v30 = vrot.slane %v22_v13, 5  ;;  %v64_v32 = vrot.slane %v24_v18, 5 }
   0x9   :  { %v577_v31 = vsel %vm888_vm2, %v60_v22, %v61_v27  ;;  %v70_v33 = vsub.f32 %v11_v9, %v32_v19  ;;  %v76_v34 = vsub.f32 %v566_v25, %v569_v26  ;;  %v71_v35 = vsub.f32 %v12_v23, %v35_v24 }
   0xa   :  { %v168_v36 = vsub.f32 0.0, %v11_v9  ;;  %v77_v40 = vsub.f32 %v571_v28, %v574_v29  ;;  %v169_v41 = vsub.f32 0.0, %v12_v23  ;;  %v587_v43 = vsel %vm888_vm2, %v63_v30, %v64_v32 }
   0xb   :  { %v72_v37 = vadd.f32 %v70_v33, %v569_v26  ;;  %v78_v38 = vsub.f32 %v76_v34, %v577_v31  ;;  %v110_v39 = vsub.f32 %v70_v33, %v569_v26  ;;  %v111_v46 = vsub.f32 %v71_v35, %v574_v29 }
   0xc   :  { %v170_v42 = vsub.f32 %v168_v36, %v32_v19  ;;  %v171_v47 = vsub.f32 %v169_v41, %v35_v24  ;;  %v204_v51 = vadd.f32 %v168_v36, %v32_v19  ;;  %v79_v52 = vsub.f32 %v77_v40, %v587_v43 }
   0xd   :  { %v74_v44 = vsub.f32 %v72_v37, %v577_v31  ;;  %v112_v45 = vadd.f32 %v110_v39, %v577_v31  ;;  %v82_v49 = vmul.f32 %v78_v38, %v78_v38  ;;  %v205_v55 = vadd.f32 %v169_v41, %v35_v24 }
   0xe   :  { %v172_v48 = vadd.f32 %v170_v42, %v569_v26  ;;  %v73_v57 = vadd.f32 %v71_v35, %v574_v29  ;;  %v113_v58 = vadd.f32 %v111_v46, %v587_v43  ;;  %v173_v59 = vadd.f32 %v171_v47, %v574_v29 }
   0xf   :  { %v114_v50 = vmul.f32 %v112_v45, %v112_v45  ;;  %v80_v53 = vmul.f32 %v74_v44, %v74_v44  ;;  %v206_v61 = vsub.f32 %v204_v51, %v569_v26  ;;  %v207_v62 = vsub.f32 %v205_v55, %v574_v29 }
  0x10   :  { %v174_v54 = vadd.f32 %v172_v48, %v577_v31  ;;  %v238_v63 = vadd.f32 %v204_v51, %v569_v26  ;;  %v239_v0 = vadd.f32 %v205_v55, %v574_v29  ;;  %v83_v1 = vmul.f32 %v79_v52, %v79_v52 }
  0x11   :  { %v595_v56 = vadd.f32 %v114_v50, %v82_v49  ;;  %v604_v2 = vadd.f32 %v114_v50, %v80_v53  ;;  %v208_v4 = vadd.f32 %v206_v61, %v577_v31  ;;  %v209_v5 = vadd.f32 %v207_v62, %v587_v43 }
  0x12   :  { %v176_v60 = vmul.f32 %v174_v54, %v174_v54  ;;  %v240_v6 = vsub.f32 %v238_v63, %v577_v31  ;;  %v241_v7 = vsub.f32 %v239_v0, %v587_v43  ;;  %v75_v8 = vsub.f32 %v73_v57, %v587_v43 }
  0x13   :  { %483 = vrsqrt.f32 %v595_v56  ;;  %v115_v9 = vmul.f32 %v113_v58, %v113_v58  ;;  %v175_v10 = vadd.f32 %v173_v59, %v587_v43  ;;  %v210_v11 = vmul.f32 %v208_v4, %v208_v4 }
  0x14   :  { %v606_v3 = vadd.f32 %v176_v60, %v80_v53  ;;  %v211_v12 = vmul.f32 %v209_v5, %v209_v5  ;;  %v242_v13 = vmul.f32 %v240_v6, %v240_v6  ;;  %v243_v14 = vmul.f32 %v241_v7, %v241_v7 }
  0x15   :  { %v617_v15 = vadd.f32 %v210_v11, %v114_v50  ;;  %v81_v19 = vmul.f32 %v75_v8, %v75_v8  ;;  %v177_v20 = vmul.f32 %v175_v10, %v175_v10  ;;  %v626_v23 = vadd.f32 %v82_v49, %v80_v53 }
  0x16   :  { %485 = vrsqrt.f32 %v606_v3  ;;  %v619_v16 = vadd.f32 %v242_v13, %v82_v49  ;;  %v621_v17 = vadd.f32 %v243_v14, %v83_v1  ;;  %v623_v21 = vadd.f32 %v211_v12, %v115_v9 }
  0x17   :  { %487 = vrsqrt.f32 %v604_v2  ;;  %v629_v24 = vadd.f32 %v83_v1, %v81_v19  ;;  %v634_v33 = vadd.f32 %v115_v9, %v81_v19  ;;  %v636_v34 = vadd.f32 %v115_v9, %v83_v1 }
  0x18   :  { %489 = vrsqrt.f32 %v619_v16  ;;  %v638_v35 = vadd.f32 %v177_v20, %v81_v19  ;;  %vm151_vm3 = vcmp.eq.f32.partialorder %v595_v56, inf  ;;  %vm187_vm4 = vcmp.eq.f32.partialorder %v606_v3, inf }
  0x19   :  { %v484_v18 = vpop.eup %483  ;;  %491 = vrsqrt.f32 %v617_v15  ;;  %vm189_vm5 = vcmp.eq.f32.partialorder %v606_v3, 0.0  ;;  %v190_v39 = vand.u32 2147483648, %v606_v3  ;;  %v154_v44 = vand.u32 2147483648, %v595_v56 }
  0x1a   :  { %v145_v30 = vmul.f32 %v484_v18, %v595_v56  ;;  %493 = vrsqrt.f32 %v621_v17  ;;  %v256_v48 = vand.u32 2147483648, %v619_v16  ;;  %vm153_vm6 = vcmp.eq.f32.partialorder %v595_v56, 0.0 }
  0x1b   :  { %495 = vrsqrt.f32 %v623_v21  ;;  %vm125_vm7 = vcmp.eq.f32.partialorder %v604_v2, inf  ;;  %v128_v49 = vand.u32 2147483648, %v604_v2  ;;  %vm253_vm8 = vcmp.eq.f32.partialorder %v619_v16, inf }
  0x1c   :  { %v486_v22 = vpop.eup %485  ;;  %v146_v37 = vmul.f32 %v484_v18, %v145_v30  ;;  %497 = vrsqrt.f32 %v626_v23  ;;  %vm255_vm9 = vcmp.eq.f32.partialorder %v619_v16, 0.0  ;;  %vm221_vm10 = vcmp.eq.f32.partialorder %v617_v15, inf }
  0x1d   :  { %v181_v27 = vmul.f32 %v486_v22, %v606_v3  ;;  %v488_v32 = vpop.eup %487  ;;  %v224_v58 = vand.u32 2147483648, %v617_v15  ;;  %vm127_vm11 = vcmp.eq.f32.partialorder %v604_v2, 0.0  ;;  %499 = vrsqrt.f32 %v638_v35 }
  0x1e   :  { %v119_v38 = vmul.f32 %v488_v32, %v604_v2  ;;  %v490_v40 = vpop.eup %489  ;;  %v147_v42 = vmul.f32 0.5, %v146_v37  ;;  %vm223_vm12 = vcmp.eq.f32.partialorder %v617_v15, 0.0  ;;  %vm265_vm13 = vcmp.eq.f32.partialorder %v621_v17, inf }
  0x1f   :  { %v182_v36 = vmul.f32 %v486_v22, %v181_v27  ;;  %v492_v46 = vpop.eup %491  ;;  %v247_v47 = vmul.f32 %v490_v40, %v619_v16  ;;  %vm267_vm14 = vcmp.eq.f32.partialorder %v621_v17, 0.0  ;;  %v268_v12 = vand.u32 2147483648, %v621_v17 }
  0x20   :  { %v120_v45 = vmul.f32 %v488_v32, %v119_v38  ;;  %v494_v50 = vpop.eup %493  ;;  %v215_v51 = vmul.f32 %v492_v46, %v617_v15  ;;  %v148_v53 = vsub.f32 1.5, %v147_v42  ;;  %vm233_vm15 = vcmp.eq.f32.partialorder %v623_v21, inf }
  0x21   :  { %v183_v41 = vmul.f32 0.5, %v182_v36  ;;  %v655_v55 = vpop.eup %495  ;;  %v248_v57 = vmul.f32 %v490_v40, %v247_v47  ;;  %v259_v59 = vmul.f32 %v494_v50, %v621_v17  ;;  %v236_v38 = vand.u32 2147483648, %v623_v21 }
  0x22   :  { %v121_v54 = vmul.f32 0.5, %v120_v45  ;;  %v216_v60 = vmul.f32 %v492_v46, %v215_v51  ;;  %v149_v62 = vmul.f32 %v484_v18, %v148_v53  ;;  %v665_v0 = vpop.eup %497  ;;  %v227_v5 = vmul.f32 %v655_v55, %v623_v21 }
  0x23   :  { %v184_v52 = vsub.f32 1.5, %v183_v41  ;;  %v249_v1 = vmul.f32 0.5, %v248_v57  ;;  %v260_v4 = vmul.f32 %v494_v50, %v259_v59  ;;  %v87_v20 = vmul.f32 %v665_v0, %v626_v23 }
  0x24   :  { %v122_v63 = vsub.f32 1.5, %v121_v54  ;;  %v217_v6 = vmul.f32 0.5, %v216_v60  ;;  %v150_v8 = vmul.f32 %v149_v62, %v595_v56  ;;  %v228_v13 = vmul.f32 %v655_v55, %v227_v5 }
  0x25   :  { %v185_v61 = vmul.f32 %v486_v22, %v184_v52  ;;  %v250_v10 = vsub.f32 1.5, %v249_v1  ;;  %v261_v11 = vmul.f32 0.5, %v260_v4  ;;  %v681_v22 = vpop.eup %499  ;;  %v96_v41 = vand.u32 2147483648, %v626_v23 }
  0x26   :  { %v123_v9 = vmul.f32 %v488_v32, %v122_v63  ;;  %v218_v14 = vsub.f32 1.5, %v217_v6  ;;  %v152_v32 = vsel %vm151_vm3, %v595_v56, %v150_v8  ;;  %v693_v42 = vadd.f32 %v569_v26, %v566_v25 }
  0x27   :  { %v186_v7 = vmul.f32 %v185_v61, %v606_v3  ;;  %v251_v27 = vmul.f32 %v490_v40, %v250_v10  ;;  %v262_v36 = vsub.f32 1.5, %v261_v11  ;;  %v229_v45 = vmul.f32 0.5, %v228_v13 }
  0x28   :  { %v124_v19 = vmul.f32 %v123_v9, %v604_v2  ;;  %v219_v37 = vmul.f32 %v492_v46, %v218_v14  ;;  %vm93_vm3 = vcmp.eq.f32.partialorder %v626_v23, inf  ;;  %v155_v51 = vsel %vm153_vm6, %v154_v44, %v152_v32 }
  0x29   :  { %v188_v18 = vsel %vm187_vm4, %v606_v3, %v186_v7  ;;  %vm235_vm4 = vcmp.eq.f32.partialorder %v623_v21, 0.0  ;;  %v252_v3 = vmul.f32 %v251_v27, %v619_v16  ;;  %v88_v25 = vmul.f32 %v665_v0, %v87_v20 }
  0x2a   :  { %v191_v30 = vsel %vm189_vm5, %v190_v39, %v188_v18  ;;  %v263_v39 = vmul.f32 %v494_v50, %v262_v36  ;;  %v126_v40 = vsel %vm125_vm7, %v604_v2, %v124_v19  ;;  %v220_v46 = vmul.f32 %v219_v37, %v617_v15 }
  0x2b   :  { %v290_v47 = vrot.slane %v191_v30, 4  ;;  %vm312_vm5 = vcmask 1044480   ;;  %vm95_vm2 = vcmp.eq.f32.partialorder %v626_v23, 0.0  ;;  %v254_v26 = vsel %vm253_vm8, %v619_v16, %v252_v3 }
  0x2c   :  { %v264_v50 = vmul.f32 %v263_v39, %v621_v17  ;;  %v230_v52 = vsub.f32 1.5, %v229_v45  ;;  %v193_v53 = vmul.f32 %v681_v22, %v638_v35  ;;  %v257_v56 = vsel %vm255_vm9, %v256_v48, %v254_v26  ;;  %v780_v39 = vld [vmem:[%s886_s1 + $0x18] sm:$0xff]  ;;  %v324_v26 = vld [vmem:[%s886_s1] sm:$0xff] }
  0x2d   :  { %v222_v44 = vsel %vm221_vm10, %v617_v15, %v220_v46  ;;  %v129_v54 = vsel %vm127_vm11, %v128_v49, %v126_v40  ;;  %v89_v57 = vmul.f32 0.5, %v88_v25  ;;  %v302_v59 = vrot.slane %v257_v56, 6 }
  0x2e   :  { %v225_v60 = vsel %vm223_vm12, %v224_v58, %v222_v44  ;;  %v266_v61 = vsel %vm265_vm13, %v621_v17, %v264_v50  ;;  %v231_v16 = vmul.f32 %v655_v55, %v230_v52  ;;  %v194_v1 = vmul.f32 %v681_v22, %v193_v53 }
  0x2f   :  { %v296_v48 = vrot.slane %v225_v60, 5  ;;  %v269_v62 = vsel %vm267_vm14, %v268_v12, %v266_v61  ;;  %v90_v63 = vsub.f32 1.5, %v89_v57  ;;  %v322_v2 = vsel %vm29_vm0, %v302_v59, 1.0  ;;  %v328_v61 = vld [vmem:[%s886_s1 + $0x20] sm:$0xff] }
  0x30   :  { %v284_v49 = vrot.slane %v155_v51, 3  ;;  %v303_v4 = vrot.slane %v269_v62, 6  ;;  %v232_v15 = vmul.f32 %v231_v16, %v623_v21  ;;  %469 = vmatpush.msk.msra.mxu2 %vm44_vm1, %v322_v2  ;;  %v278_v5 = vrot.slane %v129_v54, 2  ;;  %453 = vmatpush.msk.msra.mxu0 %vm44_vm1, %v322_v2 }
  0x31   :  { %v320_v58 = vsel %vm44_vm1, %v296_v48, %v302_v59  ;;  %v91_v55 = vmul.f32 %v665_v0, %v90_v63  ;;  %v195_v6 = vmul.f32 0.5, %v194_v1  ;;  %vm889_vm6 = vcmask 1042432  }
  0x32   :  { %v318_v17 = vsel %vm889_vm6, %v290_v47, %v296_v48  ;;  %v323_v7 = vsel %vm29_vm0, %v303_v4, 1.0  ;;  %v234_v8 = vsel %vm233_vm15, %v623_v21, %v232_v15  ;;  %501 = vrsqrt.f32 %v636_v34  ;;  %470 = vmatpush.msra.mxu2 %v320_v58  ;;  %369 = vmatpush.msra.mxu0 %v320_v58 }
  0x33   :  { %461 = vmatpush.msk.msra.mxu1 %vm44_vm1, %v323_v7  ;;  %v237_v9 = vsel %vm235_vm4, %v236_v38, %v234_v8  ;;  %v92_v0 = vmul.f32 %v91_v55, %v626_v23  ;;  %vm309_vm7 = vcmask 1045504   ;;  %v196_v10 = vsub.f32 1.5, %v195_v6  ;;  %476 = vmatpush.msk.msra.mxu3 %vm44_vm1, %v323_v7 }
  0x34   :  { %vm890_vm8 = vcmask 1043456   ;;  %v297_v12 = vrot.slane %v237_v9, 5  ;;  %vm199_vm0 = vcmp.eq.f32.partialorder %v638_v35, inf  ;;  %vm201_vm9 = vcmp.eq.f32.partialorder %v638_v35, 0.0  ;;  %471 = vmatpush.msra.mxu2 %v318_v17  ;;  %370 = vmatpush.msra.mxu0 %v318_v17  ;;  %v329_v9 = vld [vmem:[%s886_s1 + $0x28] sm:$0xff] }
  0x35   :  { %v316_v11 = vsel %vm890_vm8, %v284_v49, %v290_v47  ;;  %v94_v21 = vsel %vm93_vm3, %v626_v23, %v92_v0  ;;  %v197_v13 = vmul.f32 %v681_v22, %v196_v10  ;;  %v202_v14 = vand.u32 2147483648, %v638_v35  ;;  %vm892_vm3 = vmmov %vm890_vm8 }
  0x36   :  { %503 = vrsqrt.f32 %v634_v33  ;;  %v313_v18 = vsel %vm312_vm5, %v278_v5, %v284_v49  ;;  %v321_v19 = vsel %vm44_vm1, %v297_v12, %v303_v4  ;;  %v97_v20 = vsel %vm95_vm2, %v96_v41, %v94_v21  ;;  %472 = vmatpush.msra.mxu2 %v316_v11  ;;  %371 = vmatpush.msra.mxu0 %v316_v11  ;;  %vm891_vm2 = vmmov %vm889_vm6 }
  0x37   :  { %v68_v27 = vadd.f32 %v577_v31, %v693_v42  ;;  %407 = vmatpush.msra.mxu1 %v321_v19  ;;  %v272_v22 = vrot.slane %v97_v20, 1  ;;  %v198_v30 = vmul.f32 %v197_v13, %v638_v35  ;;  %vm306_vm10 = vcmask 1046528   ;;  %477 = vmatpush.msra.mxu3 %v321_v19 }
  0x38   :  { %505 = vrsqrt.f32 %v629_v24  ;;  %v502_v32 = vpop.eup %501  ;;  %473 = vmatpush.msra.mxu2 %v313_v18  ;;  %372 = vmatpush.msra.mxu0 %v313_v18  ;;  %vm331_vm1 = vcmask 408576   ;;  %vm163_vm11 = vcmp.eq.f32.partialorder %v636_v34, inf  ;;  %v166_v56 = vand.u32 2147483648, %v636_v34 }
  0x39   :  { %v310_v36 = vsel %vm309_vm7, %v272_v22, %v278_v5  ;;  %v200_v23 = vsel %vm199_vm0, %v638_v35, %v198_v30  ;;  %v157_v31 = vmul.f32 %v502_v32, %v636_v34  ;;  %v307_v38 = vsel %vm306_vm10, %v68_v27, %v272_v22 }
  0x3a   :  { %v203_v37 = vsel %vm201_vm9, %v202_v14, %v200_v23  ;;  %474 = vmatpush.msra.mxu2 %v310_v36  ;;  %373 = vmatpush.msra.mxu0 %v310_v36  ;;  %vm165_vm12 = vcmp.eq.f32.partialorder %v636_v34, 0.0  ;;  %vm137_vm13 = vcmp.eq.f32.partialorder %v634_v33, inf  ;;  %vm139_vm14 = vcmp.eq.f32.partialorder %v634_v33, 0.0 }
  0x3b   :  { %v291_v42 = vrot.slane %v203_v37, 4  ;;  %v158_v3 = vmul.f32 %v502_v32, %v157_v31  ;;  %v140_v48 = vand.u32 2147483648, %v634_v33  ;;  %v54_v2 = vadd.f32 %v574_v29, %v571_v28 }
  0x3c   :  { %v504_v41 = vpop.eup %503  ;;  %475 = vmatpush.msra.mxu2 %v307_v38  ;;  %374 = vmatpush.msra.mxu0 %v307_v38  ;;  %vm105_vm15 = vcmp.eq.f32.partialorder %v629_v24, inf  ;;  %v108_v4 = vand.u32 2147483648, %v629_v24  ;;  %vm107_vm4 = vcmp.eq.f32.partialorder %v629_v24, 0.0 }
  0x3d   :  { %v131_v40 = vmul.f32 %v504_v41, %v634_v33  ;;  %v319_v35 = vsel %vm891_vm2, %v291_v42, %v297_v12  ;;  %v159_v46 = vmul.f32 0.5, %v158_v3  ;;  %457 = vmatmul.msk.f32.vlgmr.msra.gmra.mxu2 %vm331_vm1, %v780_v39  ;;  %454 = vmatmul.msk.f32.vlgmr.msra.gmra.mxu0 %vm331_vm1, %v324_v26  ;;  %v69_v6 = vadd.f32 %v587_v43, %v54_v2  ;;  %v326_v43 = vld [vmem:[%s886_s1 + $0x10] sm:$0xff] }
  0x3e   :  { %v506_v45 = vpop.eup %505  ;;  %408 = vmatpush.msra.mxu1 %v319_v35  ;;  %478 = vmatpush.msra.mxu3 %v319_v35 }
  0x3f   :  { %v132_v47 = vmul.f32 %v504_v41, %v131_v40  ;;  %v99_v51 = vmul.f32 %v506_v45, %v629_v24  ;;  %v160_v25 = vsub.f32 1.5, %v159_v46 }
  0x41   :  { %v133_v50 = vmul.f32 0.5, %v132_v47  ;;  %v100_v52 = vmul.f32 %v506_v45, %v99_v51  ;;  %v161_v53 = vmul.f32 %v502_v32, %v160_v25 }
  0x43   :  { %v134_v44 = vsub.f32 1.5, %v133_v50  ;;  %v101_v54 = vmul.f32 0.5, %v100_v52  ;;  %v162_v57 = vmul.f32 %v161_v53, %v636_v34 }
  0x45   :  { %v135_v59 = vmul.f32 %v504_v41, %v134_v44  ;;  %v102_v60 = vsub.f32 1.5, %v101_v54  ;;  %v164_v16 = vsel %vm163_vm11, %v636_v34, %v162_v57  ;;  %458 = vmatmul.msk.f32.gmra.mxu2 %vm331_vm1, %v328_v61  ;;  %v325_v34 = vld [vmem:[%s886_s1 + $0x8] sm:$0xff] }
  0x46   :  { %v167_v62 = vsel %vm165_vm12, %v166_v56, %v164_v16  ;;  %455 = vmatmul.msk.f32.gmra.mxu0 %vm331_vm1, %v325_v34 }
  0x47   :  { %v136_v63 = vmul.f32 %v135_v59, %v634_v33  ;;  %v103_v1 = vmul.f32 %v506_v45, %v102_v60  ;;  %v285_v49 = vrot.slane %v167_v62, 3 }
  0x49   :  { %v138_v15 = vsel %vm137_vm13, %v634_v33, %v136_v63  ;;  %v104_v58 = vmul.f32 %v103_v1, %v629_v24  ;;  %v317_v28 = vsel %vm892_vm3, %v285_v49, %v291_v42 }
  0x4a   :  { %v141_v29 = vsel %vm139_vm14, %v140_v48, %v138_v15  ;;  %409 = vmatpush.msra.mxu1 %v317_v28  ;;  %479 = vmatpush.msra.mxu3 %v317_v28 }
  0x4b   :  { %v279_v5 = vrot.slane %v141_v29, 2  ;;  %v106_v55 = vsel %vm105_vm15, %v629_v24, %v104_v58  ;;  %v330_v24 = vld [vmem:[%s886_s1 + $0x30] sm:$0x1] }
  0x4c   :  { %v109_v17 = vsel %vm107_vm4, %v108_v4, %v106_v55 }
  0x4d   :  { %v314_v7 = vsel %vm312_vm5, %v279_v5, %v285_v49  ;;  %v273_v8 = vrot.slane %v109_v17, 1  ;;  %459 = vmatmul.msk.f32.gmra.mxu2 %vm331_vm1, %v329_v9 }
  0x4e   :  { %410 = vmatpush.msra.mxu1 %v314_v7  ;;  %480 = vmatpush.msra.mxu3 %v314_v7 }
  0x4f   :  { %v311_v33 = vsel %vm309_vm7, %v273_v8, %v279_v5  ;;  %v308_v0 = vsel %vm306_vm10, %v69_v6, %v273_v8  ;;  %456 = vmatmul.msk.f32.gmra.mxu0 %vm331_vm1, %v326_v43 }
  0x50   :  { %411 = vmatpush.msra.mxu1 %v311_v33  ;;  %481 = vmatpush.msra.mxu3 %v311_v33 }
  0x52   :  { %412 = vmatpush.msra.mxu1 %v308_v0  ;;  %482 = vmatpush.msra.mxu3 %v308_v0 }
  0x53   :  { %462 = vmatmul.msk.f32.vlgmr.msra.gmra.mxu1 %vm331_vm1, %v324_v26  ;;  %466 = vmatmul.msk.f32.vlgmr.msra.gmra.mxu3 %vm331_vm1, %v328_v61 }
  0x55   :  { %460 = vmatmul.msk.f32.gmra.mxu2 %vm331_vm1, %v330_v24 }
  0x5b   :  { %463 = vmatmul.msk.f32.gmra.mxu1 %vm331_vm1, %v325_v34  ;;  %467 = vmatmul.msk.f32.gmra.mxu3 %vm331_vm1, %v329_v9 }
  0x63   :  { %464 = vmatmul.msk.f32.gmra.mxu1 %vm331_vm1, %v326_v43  ;;  %468 = vmatmul.msk.f32.gmra.mxu3 %vm331_vm1, %v330_v24 }
  0x6b   :  { %465 = vmatmul.msk.f32.gmra.mxu1 %vm331_vm1, %v780_v39 }
  0xba   :  { %v376_v10 = vpop.f32.mrf.mxu0 }
  0xbb   :  { %435 = vst [vmem:[%s887_s2] sm:$0xff] %v376_v10 }
  0xc0   :  { %v385_v11 = vpop.f32.mrf.mxu2 }
  0xc1   :  { %441 = vst [vmem:[%s887_s2 + $0x30] sm:$0xff] %v385_v11 }
  0xc3   :  { %v379_v12 = vpop.f32.mrf.mxu0 }
  0xc4   :  { %437 = vst [vmem:[%s887_s2 + $0x10] sm:$0xff] %v379_v12 }
  0xc8   :  { %v388_v21 = vpop.f32.mrf.mxu2 }
  0xc9   :  { %443 = vst [vmem:[%s887_s2 + $0x40] sm:$0xff] %v388_v21 }
  0xcc   :  { %v382_v13 = vpop.f32.mrf.mxu0 }
  0xcd   :  { %439 = vst [vmem:[%s887_s2 + $0x20] sm:$0xff] %v382_v13 }
  0xd0   :  { %v414_v14 = vpop.f32.mrf.mxu1  ;;  %v391_v18 = vpop.f32.mrf.mxu2 }
  0xd1   :  { %436 = vst [vmem:[%s887_s2 + $0x8] sm:$0xff] %v414_v14 }
  0xd2   :  { %445 = vst [vmem:[%s887_s2 + $0x50] sm:$0xff] %v391_v18 }
  0xd6   :  { %v426_v19 = vpop.f32.mrf.mxu3 }
  0xd7   :  { %444 = vst [vmem:[%s887_s2 + $0x48] sm:$0xff] %v426_v19 }
  0xd8   :  { %v417_v20 = vpop.f32.mrf.mxu1  ;;  %v394_v27 = vpop.f32.mrf.mxu2 }
  0xd9   :  { %438 = vst [vmem:[%s887_s2 + $0x18] sm:$0xff] %v417_v20 }
  0xda   :  { %447 = vst [vmem:[%s887_s2 + $0x60] sm:$0x1] %v394_v27 }
  0xde   :  { %v429_v22 = vpop.f32.mrf.mxu3 }
  0xdf   :  { %446 = vst [vmem:[%s887_s2 + $0x58] sm:$0xff] %v429_v22 }
  0xe0   :  { %v420_v30 = vpop.f32.mrf.mxu1 }
  0xe1   :  { %440 = vst [vmem:[%s887_s2 + $0x28] sm:$0xff] %v420_v30 }
  0xe6   :  { %v432_v32 = vpop.f32.mrf.mxu3 }
  0xe7   :  { %448 = vst [vmem:[%s887_s2 + $0x68] sm:$0x1] %v432_v32 }
  0xe8   :  { %v423_v36 = vpop.f32.mrf.mxu1 }
  0xe9   :  { %442 = vst [vmem:[%s887_s2 + $0x38] sm:$0xff] %v423_v36 }

// kernel: invnet_forward.5
= control target key start
LH: loop header
LB: loop body
LE: loop exit
PB: predicated region body
PF: predicated region fallthrough
CT: control target
= control target key end

     0   :  { %vm378_vm0 = vcmask 1040384   ;;  %vm371_vm1 = vcmask 793600   ;;  %vm842_vm2 = vcmask 1041408   ;;  %vm835_vm3 = vcmask 80896   ;;  %s1995_s0 = inlined_call_operand.vmem [shape: f32[2401,128], index: 0, kind: input, shape index: {}]   ;;  %s1996_s1 = inlined_call_operand.vmem [shape: f32[10,2401], index: 1, kind: input, shape index: {}]   ;;  %s1997_s2 = inlined_call_operand.vmem [shape: f32[10,1], index: 2, kind: input, shape index: {}]   ;;  %s1998_s4 = inlined_call_operand.vmem [shape: f32[10,1], index: 4, kind: input, shape index: {}]   ;;  %s1999_s3 = inlined_call_operand.vmem [shape: f32[10,10], index: 3, kind: input, shape index: {}]   ;;  %s2000_s5 = inlined_call_operand.vmem [shape: f32[10,128], index: 5, kind: output, shape index: {}]  }
   0x1   :  { %v73_v0 = vld [vmem:[%s1995_s0 + $0x78] sm:$0xff]  ;;  %v72_v2 = vld [vmem:[%s1995_s0 + $0x70] sm:$0xff]  ;;  %v71_v6 = vld [vmem:[%s1995_s0 + $0x68] sm:$0xff] }
   0x2   :  { %v105_v1 = vld [vmem:[%s1995_s0 + $0x178] sm:$0xff]  ;;  %382 = vmatpush.msra.mxu0 %v73_v0  ;;  %v104_v4 = vld [vmem:[%s1995_s0 + $0x170] sm:$0xff]  ;;  %v103_v8 = vld [vmem:[%s1995_s0 + $0x168] sm:$0xff] }
   0x3   :  { %428 = vmatpush.msra.mxu2 %v105_v1  ;;  %v89_v3 = vld [vmem:[%s1995_s0 + $0xf8] sm:$0xff]  ;;  %v88_v7 = vld [vmem:[%s1995_s0 + $0xf0] sm:$0xff]  ;;  %v87_v10 = vld [vmem:[%s1995_s0 + $0xe8] sm:$0xff] }
   0x4   :  { %v121_v5 = vld [vmem:[%s1995_s0 + $0x1f8] sm:$0xff]  ;;  %405 = vmatpush.msra.mxu1 %v89_v3  ;;  %383 = vmatpush.msra.mxu0 %v72_v2  ;;  %v120_v9 = vld [vmem:[%s1995_s0 + $0x1f0] sm:$0xff]  ;;  %v70_v11 = vld [vmem:[%s1995_s0 + $0x60] sm:$0xff] }
   0x5   :  { %451 = vmatpush.msra.mxu3 %v121_v5  ;;  %429 = vmatpush.msra.mxu2 %v104_v4  ;;  %v102_v12 = vld [vmem:[%s1995_s0 + $0x160] sm:$0xff]  ;;  %v119_v13 = vld [vmem:[%s1995_s0 + $0x1e8] sm:$0xff]  ;;  %v69_v16 = vld [vmem:[%s1995_s0 + $0x58] sm:$0xff] }
   0x6   :  { %406 = vmatpush.msra.mxu1 %v88_v7  ;;  %384 = vmatpush.msra.mxu0 %v71_v6  ;;  %v86_v14 = vld [vmem:[%s1995_s0 + $0xe0] sm:$0xff]  ;;  %v101_v17 = vld [vmem:[%s1995_s0 + $0x158] sm:$0xff]  ;;  %v68_v20 = vld [vmem:[%s1995_s0 + $0x50] sm:$0xff] }
   0x7   :  { %452 = vmatpush.msra.mxu3 %v120_v9  ;;  %430 = vmatpush.msra.mxu2 %v103_v8  ;;  %v118_v15 = vld [vmem:[%s1995_s0 + $0x1e0] sm:$0xff]  ;;  %v85_v18 = vld [vmem:[%s1995_s0 + $0xd8] sm:$0xff]  ;;  %v100_v21 = vld [vmem:[%s1995_s0 + $0x150] sm:$0xff] }
   0x8   :  { %407 = vmatpush.msra.mxu1 %v87_v10  ;;  %385 = vmatpush.msra.mxu0 %v70_v11  ;;  %v117_v19 = vld [vmem:[%s1995_s0 + $0x1d8] sm:$0xff]  ;;  %v84_v22 = vld [vmem:[%s1995_s0 + $0xd0] sm:$0xff]  ;;  %v67_v24 = vld [vmem:[%s1995_s0 + $0x48] sm:$0xff] }
   0x9   :  { %453 = vmatpush.msra.mxu3 %v119_v13  ;;  %431 = vmatpush.msra.mxu2 %v102_v12  ;;  %v116_v23 = vld [vmem:[%s1995_s0 + $0x1d0] sm:$0xff]  ;;  %v99_v25 = vld [vmem:[%s1995_s0 + $0x148] sm:$0xff]  ;;  %v66_v28 = vld [vmem:[%s1995_s0 + $0x40] sm:$0xff] }
   0xa   :  { %408 = vmatpush.msra.mxu1 %v86_v14  ;;  %386 = vmatpush.msra.mxu0 %v69_v16  ;;  %v83_v26 = vld [vmem:[%s1995_s0 + $0xc8] sm:$0xff]  ;;  %v98_v29 = vld [vmem:[%s1995_s0 + $0x140] sm:$0xff]  ;;  %v65_v32 = vld [vmem:[%s1995_s0 + $0x38] sm:$0xff] }
   0xb   :  { %454 = vmatpush.msra.mxu3 %v118_v15  ;;  %432 = vmatpush.msra.mxu2 %v101_v17  ;;  %v115_v27 = vld [vmem:[%s1995_s0 + $0x1c8] sm:$0xff]  ;;  %v82_v30 = vld [vmem:[%s1995_s0 + $0xc0] sm:$0xff]  ;;  %v97_v33 = vld [vmem:[%s1995_s0 + $0x138] sm:$0xff] }
   0xc   :  { %409 = vmatpush.msra.mxu1 %v85_v18  ;;  %387 = vmatpush.msra.mxu0 %v68_v20  ;;  %v114_v31 = vld [vmem:[%s1995_s0 + $0x1c0] sm:$0xff]  ;;  %v81_v34 = vld [vmem:[%s1995_s0 + $0xb8] sm:$0xff]  ;;  %v64_v36 = vld [vmem:[%s1995_s0 + $0x30] sm:$0xff] }
   0xd   :  { %455 = vmatpush.msra.mxu3 %v117_v19  ;;  %433 = vmatpush.msra.mxu2 %v100_v21  ;;  %v113_v35 = vld [vmem:[%s1995_s0 + $0x1b8] sm:$0xff]  ;;  %v96_v37 = vld [vmem:[%s1995_s0 + $0x130] sm:$0xff]  ;;  %v63_v40 = vld [vmem:[%s1995_s0 + $0x28] sm:$0xff] }
   0xe   :  { %410 = vmatpush.msra.mxu1 %v84_v22  ;;  %388 = vmatpush.msra.mxu0 %v67_v24  ;;  %v80_v38 = vld [vmem:[%s1995_s0 + $0xb0] sm:$0xff]  ;;  %v95_v41 = vld [vmem:[%s1995_s0 + $0x128] sm:$0xff]  ;;  %v62_v44 = vld [vmem:[%s1995_s0 + $0x20] sm:$0xff] }
   0xf   :  { %456 = vmatpush.msra.mxu3 %v116_v23  ;;  %434 = vmatpush.msra.mxu2 %v99_v25  ;;  %v112_v39 = vld [vmem:[%s1995_s0 + $0x1b0] sm:$0xff]  ;;  %v79_v42 = vld [vmem:[%s1995_s0 + $0xa8] sm:$0xff]  ;;  %v94_v45 = vld [vmem:[%s1995_s0 + $0x120] sm:$0xff] }
  0x10   :  { %411 = vmatpush.msra.mxu1 %v83_v26  ;;  %389 = vmatpush.msra.mxu0 %v66_v28  ;;  %v111_v43 = vld [vmem:[%s1995_s0 + $0x1a8] sm:$0xff]  ;;  %v78_v46 = vld [vmem:[%s1995_s0 + $0xa0] sm:$0xff]  ;;  %v61_v48 = vld [vmem:[%s1995_s0 + $0x18] sm:$0xff] }
  0x11   :  { %457 = vmatpush.msra.mxu3 %v115_v27  ;;  %435 = vmatpush.msra.mxu2 %v98_v29  ;;  %v110_v47 = vld [vmem:[%s1995_s0 + $0x1a0] sm:$0xff]  ;;  %v93_v49 = vld [vmem:[%s1995_s0 + $0x118] sm:$0xff]  ;;  %v60_v52 = vld [vmem:[%s1995_s0 + $0x10] sm:$0xff] }
  0x12   :  { %412 = vmatpush.msra.mxu1 %v82_v30  ;;  %390 = vmatpush.msra.mxu0 %v65_v32  ;;  %v77_v50 = vld [vmem:[%s1995_s0 + $0x98] sm:$0xff]  ;;  %v92_v53 = vld [vmem:[%s1995_s0 + $0x110] sm:$0xff]  ;;  %v59_v56 = vld [vmem:[%s1995_s0 + $0x8] sm:$0xff] }
  0x13   :  { %458 = vmatpush.msra.mxu3 %v114_v31  ;;  %436 = vmatpush.msra.mxu2 %v97_v33  ;;  %v109_v51 = vld [vmem:[%s1995_s0 + $0x198] sm:$0xff]  ;;  %v76_v54 = vld [vmem:[%s1995_s0 + $0x90] sm:$0xff]  ;;  %v91_v57 = vld [vmem:[%s1995_s0 + $0x108] sm:$0xff] }
  0x14   :  { %413 = vmatpush.msra.mxu1 %v81_v34  ;;  %391 = vmatpush.msra.mxu0 %v64_v36  ;;  %v108_v55 = vld [vmem:[%s1995_s0 + $0x190] sm:$0xff]  ;;  %v75_v58 = vld [vmem:[%s1995_s0 + $0x88] sm:$0xff]  ;;  %v58_v60 = vld [vmem:[%s1995_s0] sm:$0xff] }
  0x15   :  { %459 = vmatpush.msra.mxu3 %v113_v35  ;;  %437 = vmatpush.msra.mxu2 %v96_v37  ;;  %v107_v59 = vld [vmem:[%s1995_s0 + $0x188] sm:$0xff]  ;;  %v90_v61 = vld [vmem:[%s1995_s0 + $0x100] sm:$0xff]  ;;  %v137_v62 = vld [vmem:[%s1995_s0 + $0x278] sm:$0xff] }
  0x16   :  { %414 = vmatpush.msra.mxu1 %v80_v38  ;;  %392 = vmatpush.msra.mxu0 %v63_v40  ;;  %v169_v63 = vld [vmem:[%s1995_s0 + $0x378] sm:$0xff]  ;;  %v74_v0 = vld [vmem:[%s1995_s0 + $0x80] sm:$0xff]  ;;  %v136_v2 = vld [vmem:[%s1995_s0 + $0x270] sm:$0xff] }
  0x17   :  { %460 = vmatpush.msra.mxu3 %v112_v39  ;;  %438 = vmatpush.msra.mxu2 %v95_v41  ;;  %v106_v1 = vld [vmem:[%s1995_s0 + $0x180] sm:$0xff]  ;;  %v153_v3 = vld [vmem:[%s1995_s0 + $0x2f8] sm:$0xff]  ;;  %v168_v4 = vld [vmem:[%s1995_s0 + $0x370] sm:$0xff] }
  0x18   :  { %415 = vmatpush.msra.mxu1 %v79_v42  ;;  %393 = vmatpush.msra.mxu0 %v62_v44  ;;  %v185_v5 = vld [vmem:[%s1995_s0 + $0x3f8] sm:$0xff]  ;;  %v135_v6 = vld [vmem:[%s1995_s0 + $0x268] sm:$0xff]  ;;  %v152_v7 = vld [vmem:[%s1995_s0 + $0x2f0] sm:$0xff] }
  0x19   :  { %461 = vmatpush.msra.mxu3 %v111_v43  ;;  %439 = vmatpush.msra.mxu2 %v94_v45  ;;  %v167_v8 = vld [vmem:[%s1995_s0 + $0x368] sm:$0xff]  ;;  %v184_v9 = vld [vmem:[%s1995_s0 + $0x3f0] sm:$0xff]  ;;  %v134_v10 = vld [vmem:[%s1995_s0 + $0x260] sm:$0xff] }
  0x1a   :  { %416 = vmatpush.msra.mxu1 %v78_v46  ;;  %394 = vmatpush.msra.mxu0 %v61_v48  ;;  %v151_v11 = vld [vmem:[%s1995_s0 + $0x2e8] sm:$0xff]  ;;  %v166_v12 = vld [vmem:[%s1995_s0 + $0x360] sm:$0xff]  ;;  %v133_v14 = vld [vmem:[%s1995_s0 + $0x258] sm:$0xff] }
  0x1b   :  { %462 = vmatpush.msra.mxu3 %v110_v47  ;;  %440 = vmatpush.msra.mxu2 %v93_v49  ;;  %v183_v13 = vld [vmem:[%s1995_s0 + $0x3e8] sm:$0xff]  ;;  %v150_v15 = vld [vmem:[%s1995_s0 + $0x2e0] sm:$0xff]  ;;  %v165_v16 = vld [vmem:[%s1995_s0 + $0x358] sm:$0xff] }
  0x1c   :  { %417 = vmatpush.msra.mxu1 %v77_v50  ;;  %395 = vmatpush.msra.mxu0 %v60_v52  ;;  %v182_v17 = vld [vmem:[%s1995_s0 + $0x3e0] sm:$0xff]  ;;  %v132_v18 = vld [vmem:[%s1995_s0 + $0x250] sm:$0xff]  ;;  %v149_v19 = vld [vmem:[%s1995_s0 + $0x2d8] sm:$0xff] }
  0x1d   :  { %463 = vmatpush.msra.mxu3 %v109_v51  ;;  %441 = vmatpush.msra.mxu2 %v92_v53  ;;  %v164_v20 = vld [vmem:[%s1995_s0 + $0x350] sm:$0xff]  ;;  %v181_v21 = vld [vmem:[%s1995_s0 + $0x3d8] sm:$0xff]  ;;  %v131_v22 = vld [vmem:[%s1995_s0 + $0x248] sm:$0xff] }
  0x1e   :  { %418 = vmatpush.msra.mxu1 %v76_v54  ;;  %396 = vmatpush.msra.mxu0 %v59_v56  ;;  %v148_v23 = vld [vmem:[%s1995_s0 + $0x2d0] sm:$0xff]  ;;  %v163_v24 = vld [vmem:[%s1995_s0 + $0x348] sm:$0xff]  ;;  %v130_v26 = vld [vmem:[%s1995_s0 + $0x240] sm:$0xff] }
  0x1f   :  { %464 = vmatpush.msra.mxu3 %v108_v55  ;;  %442 = vmatpush.msra.mxu2 %v91_v57  ;;  %v180_v25 = vld [vmem:[%s1995_s0 + $0x3d0] sm:$0xff]  ;;  %v147_v27 = vld [vmem:[%s1995_s0 + $0x2c8] sm:$0xff]  ;;  %v162_v28 = vld [vmem:[%s1995_s0 + $0x340] sm:$0xff] }
  0x20   :  { %419 = vmatpush.msra.mxu1 %v75_v58  ;;  %397 = vmatpush.msra.mxu0 %v58_v60  ;;  %v179_v29 = vld [vmem:[%s1995_s0 + $0x3c8] sm:$0xff]  ;;  %v129_v30 = vld [vmem:[%s1995_s0 + $0x238] sm:$0xff]  ;;  %v146_v31 = vld [vmem:[%s1995_s0 + $0x2c0] sm:$0xff] }
  0x21   :  { %465 = vmatpush.msra.mxu3 %v107_v59  ;;  %443 = vmatpush.msra.mxu2 %v90_v61  ;;  %v161_v32 = vld [vmem:[%s1995_s0 + $0x338] sm:$0xff]  ;;  %v178_v33 = vld [vmem:[%s1995_s0 + $0x3c0] sm:$0xff]  ;;  %v128_v34 = vld [vmem:[%s1995_s0 + $0x230] sm:$0xff] }
  0x22   :  { %474 = vmatpush.msrb.mxu0 %v137_v62  ;;  %420 = vmatpush.msra.mxu1 %v74_v0  ;;  %v145_v35 = vld [vmem:[%s1995_s0 + $0x2b8] sm:$0xff]  ;;  %v160_v36 = vld [vmem:[%s1995_s0 + $0x330] sm:$0xff]  ;;  %v127_v38 = vld [vmem:[%s1995_s0 + $0x228] sm:$0xff] }
  0x23   :  { %520 = vmatpush.msrb.mxu2 %v169_v63  ;;  %466 = vmatpush.msra.mxu3 %v106_v1  ;;  %v177_v37 = vld [vmem:[%s1995_s0 + $0x3b8] sm:$0xff]  ;;  %v144_v39 = vld [vmem:[%s1995_s0 + $0x2b0] sm:$0xff]  ;;  %v159_v40 = vld [vmem:[%s1995_s0 + $0x328] sm:$0xff] }
  0x24   :  { %475 = vmatpush.msrb.mxu0 %v136_v2  ;;  %497 = vmatpush.msrb.mxu1 %v153_v3  ;;  %v176_v41 = vld [vmem:[%s1995_s0 + $0x3b0] sm:$0xff]  ;;  %v126_v43 = vld [vmem:[%s1995_s0 + $0x220] sm:$0xff]  ;;  %v143_v44 = vld [vmem:[%s1995_s0 + $0x2a8] sm:$0xff] }
  0x25   :  { %521 = vmatpush.msrb.mxu2 %v168_v4  ;;  %543 = vmatpush.msrb.mxu3 %v185_v5  ;;  %v22_v42 = vld [vmem:[%s1996_s1 + $0x10] sm:$0xff]  ;;  %v158_v45 = vld [vmem:[%s1995_s0 + $0x320] sm:$0xff]  ;;  %v175_v46 = vld [vmem:[%s1995_s0 + $0x3a8] sm:$0xff] }
  0x26   :  { %476 = vmatpush.msrb.mxu0 %v135_v6  ;;  %498 = vmatpush.msrb.mxu1 %v152_v7  ;;  %v20_v47 = vld [vmem:[%s1996_s1] sm:$0xff]  ;;  %v23_v48 = vld [vmem:[%s1996_s1 + $0x18] sm:$0xff]  ;;  %v21_v53 = vld [vmem:[%s1996_s1 + $0x8] sm:$0xff] }
  0x27   :  { %522 = vmatpush.msrb.mxu2 %v167_v8  ;;  %544 = vmatpush.msrb.mxu3 %v184_v9  ;;  %v125_v49 = vld [vmem:[%s1995_s0 + $0x218] sm:$0xff]  ;;  %v142_v50 = vld [vmem:[%s1995_s0 + $0x2a0] sm:$0xff]  ;;  %v124_v54 = vld [vmem:[%s1995_s0 + $0x210] sm:$0xff] }
  0x28   :  { %477 = vmatpush.msrb.mxu0 %v134_v10  ;;  %499 = vmatpush.msrb.mxu1 %v151_v11  ;;  %v157_v51 = vld [vmem:[%s1995_s0 + $0x318] sm:$0xff]  ;;  %v174_v52 = vld [vmem:[%s1995_s0 + $0x3a0] sm:$0xff]  ;;  %v156_v56 = vld [vmem:[%s1995_s0 + $0x310] sm:$0xff] }
  0x29   :  { %523 = vmatpush.msrb.mxu2 %v166_v12  ;;  %545 = vmatpush.msrb.mxu3 %v183_v13  ;;  %v141_v55 = vld [vmem:[%s1995_s0 + $0x298] sm:$0xff]  ;;  %v123_v58 = vld [vmem:[%s1995_s0 + $0x208] sm:$0xff]  ;;  %v140_v59 = vld [vmem:[%s1995_s0 + $0x290] sm:$0xff]  ;;  %v916_v13 = vmov 0  }
  0x2a   :  { %478 = vmatpush.msrb.mxu0 %v133_v14  ;;  %500 = vmatpush.msrb.mxu1 %v150_v15  ;;  %v173_v57 = vld [vmem:[%s1995_s0 + $0x398] sm:$0xff]  ;;  %v155_v60 = vld [vmem:[%s1995_s0 + $0x308] sm:$0xff]  ;;  %v172_v61 = vld [vmem:[%s1995_s0 + $0x390] sm:$0xff] }
  0x2b   :  { %524 = vmatpush.msrb.mxu2 %v165_v16  ;;  %546 = vmatpush.msrb.mxu3 %v182_v17  ;;  %v41_v62 = vld [vmem:[%s1996_s1 + $0xa8] sm:$0x3]  ;;  %v122_v63 = vld [vmem:[%s1995_s0 + $0x200] sm:$0xff]  ;;  %v39_v3 = vld [vmem:[%s1996_s1 + $0x98] sm:$0x3] }
  0x2c   :  { %479 = vmatpush.msrb.mxu0 %v132_v18  ;;  %501 = vmatpush.msrb.mxu1 %v149_v19  ;;  %v139_v0 = vld [vmem:[%s1995_s0 + $0x288] sm:$0xff]  ;;  %v154_v1 = vld [vmem:[%s1995_s0 + $0x300] sm:$0xff]  ;;  %v42_v4 = vld [vmem:[%s1996_s1 + $0xb0] sm:$0x3] }
  0x2d   :  { %525 = vmatpush.msrb.mxu2 %v164_v20  ;;  %547 = vmatpush.msrb.mxu3 %v181_v21  ;;  %v171_v2 = vld [vmem:[%s1995_s0 + $0x388] sm:$0xff]  ;;  %v201_v5 = vld [vmem:[%s1995_s0 + $0x478] sm:$0xff]  ;;  %v138_v7 = vld [vmem:[%s1995_s0 + $0x280] sm:$0xff] }
  0x2e   :  { %480 = vmatpush.msrb.mxu0 %v131_v22  ;;  %502 = vmatpush.msrb.mxu1 %v148_v23  ;;  %v233_v6 = vld [vmem:[%s1995_s0 + $0x578] sm:$0xff]  ;;  %v170_v8 = vld [vmem:[%s1995_s0 + $0x380] sm:$0xff]  ;;  %v200_v10 = vld [vmem:[%s1995_s0 + $0x470] sm:$0xff] }
  0x2f   :  { %526 = vmatpush.msrb.mxu2 %v163_v24  ;;  %548 = vmatpush.msrb.mxu3 %v180_v25  ;;  %v40_v9 = vld [vmem:[%s1996_s1 + $0xa0] sm:$0x3]  ;;  %v217_v11 = vld [vmem:[%s1995_s0 + $0x4f8] sm:$0xff]  ;;  %v232_v12 = vld [vmem:[%s1995_s0 + $0x570] sm:$0xff] }
  0x30   :  { %481 = vmatpush.msrb.mxu0 %v130_v26  ;;  %503 = vmatpush.msrb.mxu1 %v147_v27  ;;  %v249_v14 = vld [vmem:[%s1995_s0 + $0x5f8] sm:$0xff]  ;;  %v360_v15 = vld [vmem:[%s1997_s2 + $0x8] sm:$0x3]  ;;  %v216_v17 = vld [vmem:[%s1995_s0 + $0x4f0] sm:$0xff] }
  0x31   :  { %527 = vmatpush.msrb.mxu2 %v162_v28  ;;  %549 = vmatpush.msrb.mxu3 %v179_v29  ;;  %v199_v16 = vld [vmem:[%s1995_s0 + $0x468] sm:$0xff]  ;;  %v248_v19 = vld [vmem:[%s1995_s0 + $0x5f0] sm:$0xff]  ;;  %v198_v21 = vld [vmem:[%s1995_s0 + $0x460] sm:$0xff] }
  0x32   :  { %482 = vmatpush.msrb.mxu0 %v129_v30  ;;  %504 = vmatpush.msrb.mxu1 %v146_v31  ;;  %v231_v18 = vld [vmem:[%s1995_s0 + $0x568] sm:$0xff]  ;;  %v26_v20 = vld [vmem:[%s1996_s1 + $0x30] sm:$0xff]  ;;  %v230_v23 = vld [vmem:[%s1995_s0 + $0x560] sm:$0xff] }
  0x33   :  { %528 = vmatpush.msrb.mxu2 %v161_v32  ;;  %550 = vmatpush.msrb.mxu3 %v178_v33  ;;  %v215_v22 = vld [vmem:[%s1995_s0 + $0x4e8] sm:$0xff]  ;;  %v24_v25 = vld [vmem:[%s1996_s1 + $0x20] sm:$0xff]  ;;  %v27_v26 = vld [vmem:[%s1996_s1 + $0x38] sm:$0xff] }
  0x34   :  { %483 = vmatpush.msrb.mxu0 %v128_v34  ;;  %505 = vmatpush.msrb.mxu1 %v145_v35  ;;  %v247_v24 = vld [vmem:[%s1995_s0 + $0x5e8] sm:$0xff]  ;;  %v197_v27 = vld [vmem:[%s1995_s0 + $0x458] sm:$0xff]  ;;  %v214_v28 = vld [vmem:[%s1995_s0 + $0x4e0] sm:$0xff] }
  0x35   :  { %529 = vmatpush.msrb.mxu2 %v160_v36  ;;  %551 = vmatpush.msrb.mxu3 %v177_v37  ;;  %v229_v29 = vld [vmem:[%s1995_s0 + $0x558] sm:$0xff]  ;;  %v246_v30 = vld [vmem:[%s1995_s0 + $0x5e0] sm:$0xff]  ;;  %v25_v31 = vld [vmem:[%s1996_s1 + $0x28] sm:$0xff] }
  0x36   :  { %484 = vmatpush.msrb.mxu0 %v127_v38  ;;  %506 = vmatpush.msrb.mxu1 %v144_v39  ;;  %v196_v32 = vld [vmem:[%s1995_s0 + $0x450] sm:$0xff]  ;;  %v213_v33 = vld [vmem:[%s1995_s0 + $0x4d8] sm:$0xff]  ;;  %v359_v36 = vld [vmem:[%s1997_s2] sm:$0xff] }
  0x37   :  { %530 = vmatpush.msrb.mxu2 %v159_v40  ;;  %552 = vmatpush.msrb.mxu3 %v176_v41  ;;  %v228_v34 = vld [vmem:[%s1995_s0 + $0x550] sm:$0xff]  ;;  %v245_v35 = vld [vmem:[%s1995_s0 + $0x5d8] sm:$0xff]  ;;  %v195_v37 = vld [vmem:[%s1995_s0 + $0x448] sm:$0xff] }
  0x38   :  { %444 = vmatmul.f32.vlgmr.msra.gmra.mxu2 %v22_v42  ;;  %485 = vmatpush.msrb.mxu0 %v126_v43  ;;  %v212_v38 = vld [vmem:[%s1995_s0 + $0x4d0] sm:$0xff]  ;;  %v227_v39 = vld [vmem:[%s1995_s0 + $0x548] sm:$0xff]  ;;  %v194_v41 = vld [vmem:[%s1995_s0 + $0x440] sm:$0xff] }
  0x39   :  { %507 = vmatpush.msrb.mxu1 %v143_v44  ;;  %531 = vmatpush.msrb.mxu2 %v158_v45  ;;  %v244_v40 = vld [vmem:[%s1995_s0 + $0x5d0] sm:$0xff]  ;;  %v211_v42 = vld [vmem:[%s1995_s0 + $0x4c8] sm:$0xff]  ;;  %v226_v43 = vld [vmem:[%s1995_s0 + $0x540] sm:$0xff] }
  0x3a   :  { %553 = vmatpush.msrb.mxu3 %v175_v46  ;;  %398 = vmatmul.f32.vlgmr.msra.gmra.mxu0 %v20_v47  ;;  %v243_v44 = vld [vmem:[%s1995_s0 + $0x5c8] sm:$0xff]  ;;  %v193_v45 = vld [vmem:[%s1995_s0 + $0x438] sm:$0xff]  ;;  %v210_v46 = vld [vmem:[%s1995_s0 + $0x4c0] sm:$0xff] }
  0x3b   :  { %467 = vmatmul.f32.vlgmr.msra.gmra.mxu3 %v23_v48  ;;  %486 = vmatpush.msrb.mxu0 %v125_v49  ;;  %v225_v47 = vld [vmem:[%s1995_s0 + $0x538] sm:$0xff]  ;;  %v242_v48 = vld [vmem:[%s1995_s0 + $0x5c0] sm:$0xff]  ;;  %v192_v49 = vld [vmem:[%s1995_s0 + $0x430] sm:$0xff] }
  0x3c   :  { %508 = vmatpush.msrb.mxu1 %v142_v50  ;;  %532 = vmatpush.msrb.mxu2 %v157_v51  ;;  %v209_v50 = vld [vmem:[%s1995_s0 + $0x4b8] sm:$0xff]  ;;  %v224_v51 = vld [vmem:[%s1995_s0 + $0x530] sm:$0xff] }
  0x3d   :  { %554 = vmatpush.msrb.mxu3 %v174_v52  ;;  %421 = vmatmul.f32.vlgmr.msra.gmra.mxu1 %v21_v53  ;;  %v241_v52 = vld [vmem:[%s1995_s0 + $0x5b8] sm:$0xff]  ;;  %v191_v53 = vld [vmem:[%s1995_s0 + $0x428] sm:$0xff] }
  0x3e   :  { %487 = vmatpush.msrb.mxu0 %v124_v54  ;;  %509 = vmatpush.msrb.mxu1 %v141_v55  ;;  %v208_v54 = vld [vmem:[%s1995_s0 + $0x4b0] sm:$0xff]  ;;  %v223_v55 = vld [vmem:[%s1995_s0 + $0x528] sm:$0xff] }
  0x3f   :  { %533 = vmatpush.msrb.mxu2 %v156_v56  ;;  %555 = vmatpush.msrb.mxu3 %v173_v57  ;;  %v240_v56 = vld [vmem:[%s1995_s0 + $0x5b0] sm:$0xff]  ;;  %v190_v57 = vld [vmem:[%s1995_s0 + $0x420] sm:$0xff] }
  0x40   :  { %488 = vmatpush.msrb.mxu0 %v123_v58  ;;  %510 = vmatpush.msrb.mxu1 %v140_v59  ;;  %v207_v58 = vld [vmem:[%s1995_s0 + $0x4a8] sm:$0xff]  ;;  %v222_v59 = vld [vmem:[%s1995_s0 + $0x520] sm:$0xff] }
  0x41   :  { %534 = vmatpush.msrb.mxu2 %v155_v60  ;;  %556 = vmatpush.msrb.mxu3 %v172_v61  ;;  %v239_v60 = vld [vmem:[%s1995_s0 + $0x5a8] sm:$0xff]  ;;  %v43_v61 = vld [vmem:[%s1996_s1 + $0xb8] sm:$0x3] }
  0x42   :  { %447 = vmatmul.f32.gmra.mxu2 %v41_v62  ;;  %489 = vmatpush.msrb.mxu0 %v122_v63  ;;  %v45_v62 = vld [vmem:[%s1996_s1 + $0xc8] sm:$0x3]  ;;  %v189_v63 = vld [vmem:[%s1995_s0 + $0x418] sm:$0xff] }
  0x43   :  { %511 = vmatpush.msrb.mxu1 %v139_v0  ;;  %535 = vmatpush.msrb.mxu2 %v154_v1  ;;  %v206_v0 = vld [vmem:[%s1995_s0 + $0x4a0] sm:$0xff]  ;;  %v221_v1 = vld [vmem:[%s1995_s0 + $0x518] sm:$0xff] }
  0x44   :  { %557 = vmatpush.msrb.mxu3 %v171_v2  ;;  %401 = vmatmul.f32.gmra.mxu0 %v39_v3  ;;  %v238_v2 = vld [vmem:[%s1995_s0 + $0x5a0] sm:$0xff] }
  0x45   :  { %470 = vmatmul.f32.gmra.mxu3 %v42_v4  ;;  %566 = vmatpush.msra.mxu0 %v201_v5  ;;  %v44_v3 = vld [vmem:[%s1996_s1 + $0xc0] sm:$0x3]  ;;  %v46_v4 = vld [vmem:[%s1996_s1 + $0xd0] sm:$0x3] }
  0x46   :  { %612 = vmatpush.msra.mxu2 %v233_v6  ;;  %512 = vmatpush.msrb.mxu1 %v138_v7  ;;  %v188_v5 = vld [vmem:[%s1995_s0 + $0x410] sm:$0xff]  ;;  %v205_v6 = vld [vmem:[%s1995_s0 + $0x498] sm:$0xff] }
  0x47   :  { %558 = vmatpush.msrb.mxu3 %v170_v8  ;;  %908 = vset.pattern.permute.xlu0 %v916_v13  ;;  %v220_v7 = vld [vmem:[%s1995_s0 + $0x510] sm:$0xff]  ;;  %v237_v8 = vld [vmem:[%s1995_s0 + $0x598] sm:$0xff] }
  0x48   :  { %424 = vmatmul.f32.gmra.mxu1 %v40_v9  ;;  %567 = vmatpush.msra.mxu0 %v200_v10  ;;  %v187_v9 = vld [vmem:[%s1995_s0 + $0x408] sm:$0xff]  ;;  %v204_v10 = vld [vmem:[%s1995_s0 + $0x490] sm:$0xff] }
  0x49   :  { %589 = vmatpush.msra.mxu1 %v217_v11  ;;  %613 = vmatpush.msra.mxu2 %v232_v12  ;;  %v219_v11 = vld [vmem:[%s1995_s0 + $0x508] sm:$0xff]  ;;  %v236_v12 = vld [vmem:[%s1995_s0 + $0x590] sm:$0xff] }
  0x4a   :  { %635 = vmatpush.msra.mxu3 %v249_v14  ;;  %368 = vperm.xlu0 %908, %v360_v15   ;;  %v186_v14 = vld [vmem:[%s1995_s0 + $0x400] sm:$0xff]  ;;  %v203_v15 = vld [vmem:[%s1995_s0 + $0x488] sm:$0xff] }
  0x4b   :  { %568 = vmatpush.msra.mxu0 %v199_v16  ;;  %590 = vmatpush.msra.mxu1 %v216_v17  ;;  %v218_v16 = vld [vmem:[%s1995_s0 + $0x500] sm:$0xff]  ;;  %v235_v17 = vld [vmem:[%s1995_s0 + $0x588] sm:$0xff] }
  0x4c   :  { %614 = vmatpush.msra.mxu2 %v231_v18  ;;  %636 = vmatpush.msra.mxu3 %v248_v19  ;;  %v28_v18 = vld [vmem:[%s1996_s1 + $0x40] sm:$0xff]  ;;  %v30_v19 = vld [vmem:[%s1996_s1 + $0x50] sm:$0xff] }
  0x4d   :  { %536 = vmatmul.f32.vlgmr.msrb.gmra.mxu2 %v26_v20  ;;  %569 = vmatpush.msra.mxu0 %v198_v21  ;;  %v265_v20 = vld [vmem:[%s1995_s0 + $0x678] sm:$0xff] }
  0x4e   :  { %591 = vmatpush.msra.mxu1 %v215_v22  ;;  %615 = vmatpush.msra.mxu2 %v230_v23  ;;  %v297_v21 = vld [vmem:[%s1995_s0 + $0x778] sm:$0xff]  ;;  %v202_v22 = vld [vmem:[%s1995_s0 + $0x480] sm:$0xff] }
  0x4f   :  { %637 = vmatpush.msra.mxu3 %v247_v24  ;;  %490 = vmatmul.f32.vlgmr.msrb.gmra.mxu0 %v24_v25  ;;  %v234_v23 = vld [vmem:[%s1995_s0 + $0x580] sm:$0xff]  ;;  %v29_v24 = vld [vmem:[%s1996_s1 + $0x48] sm:$0xff]  ;;  %v31_v25 = vld [vmem:[%s1996_s1 + $0x58] sm:$0xff] }
  0x50   :  { %559 = vmatmul.f32.vlgmr.msrb.gmra.mxu3 %v27_v26  ;;  %570 = vmatpush.msra.mxu0 %v197_v27  ;;  %v264_v26 = vld [vmem:[%s1995_s0 + $0x670] sm:$0xff]  ;;  %v281_v27 = vld [vmem:[%s1995_s0 + $0x6f8] sm:$0xff] }
  0x51   :  { %592 = vmatpush.msra.mxu1 %v214_v28  ;;  %616 = vmatpush.msra.mxu2 %v229_v29  ;;  %v296_v28 = vld [vmem:[%s1995_s0 + $0x770] sm:$0xff]  ;;  %v313_v29 = vld [vmem:[%s1995_s0 + $0x7f8] sm:$0xff] }
  0x52   :  { %638 = vmatpush.msra.mxu3 %v246_v30  ;;  %513 = vmatmul.f32.vlgmr.msrb.gmra.mxu1 %v25_v31  ;;  %v263_v30 = vld [vmem:[%s1995_s0 + $0x668] sm:$0xff]  ;;  %v280_v31 = vld [vmem:[%s1995_s0 + $0x6f0] sm:$0xff] }
  0x53   :  { %571 = vmatpush.msra.mxu0 %v196_v32  ;;  %593 = vmatpush.msra.mxu1 %v213_v33  ;;  %v295_v32 = vld [vmem:[%s1995_s0 + $0x768] sm:$0xff]  ;;  %v312_v33 = vld [vmem:[%s1995_s0 + $0x7f0] sm:$0xff] }
  0x54   :  { %617 = vmatpush.msra.mxu2 %v228_v34  ;;  %639 = vmatpush.msra.mxu3 %v245_v35  ;;  %v262_v34 = vld [vmem:[%s1995_s0 + $0x660] sm:$0xff]  ;;  %v279_v35 = vld [vmem:[%s1995_s0 + $0x6e8] sm:$0xff] }
  0x55   :  { %363 = vperm.xlu0 %908, %v359_v36   ;;  %572 = vmatpush.msra.mxu0 %v195_v37  ;;  %v294_v36 = vld [vmem:[%s1995_s0 + $0x760] sm:$0xff]  ;;  %v311_v37 = vld [vmem:[%s1995_s0 + $0x7e8] sm:$0xff] }
  0x56   :  { %594 = vmatpush.msra.mxu1 %v212_v38  ;;  %618 = vmatpush.msra.mxu2 %v227_v39  ;;  %v47_v38 = vld [vmem:[%s1996_s1 + $0xd8] sm:$0x3]  ;;  %v49_v39 = vld [vmem:[%s1996_s1 + $0xe8] sm:$0x3] }
  0x57   :  { %640 = vmatpush.msra.mxu3 %v244_v40  ;;  %573 = vmatpush.msra.mxu0 %v194_v41  ;;  %v261_v40 = vld [vmem:[%s1995_s0 + $0x658] sm:$0xff]  ;;  %v278_v41 = vld [vmem:[%s1995_s0 + $0x6e0] sm:$0xff] }
  0x58   :  { %595 = vmatpush.msra.mxu1 %v211_v42  ;;  %619 = vmatpush.msra.mxu2 %v226_v43  ;;  %v293_v42 = vld [vmem:[%s1995_s0 + $0x758] sm:$0xff]  ;;  %v310_v43 = vld [vmem:[%s1995_s0 + $0x7e0] sm:$0xff] }
  0x59   :  { %641 = vmatpush.msra.mxu3 %v243_v44  ;;  %574 = vmatpush.msra.mxu0 %v193_v45  ;;  %v48_v44 = vld [vmem:[%s1996_s1 + $0xe0] sm:$0x3]  ;;  %v50_v45 = vld [vmem:[%s1996_s1 + $0xf0] sm:$0x3] }
  0x5a   :  { %596 = vmatpush.msra.mxu1 %v210_v46  ;;  %620 = vmatpush.msra.mxu2 %v225_v47  ;;  %v260_v46 = vld [vmem:[%s1995_s0 + $0x650] sm:$0xff]  ;;  %v277_v47 = vld [vmem:[%s1995_s0 + $0x6d8] sm:$0xff] }
  0x5b   :  { %642 = vmatpush.msra.mxu3 %v242_v48  ;;  %575 = vmatpush.msra.mxu0 %v192_v49  ;;  %v292_v48 = vld [vmem:[%s1995_s0 + $0x750] sm:$0xff]  ;;  %v309_v49 = vld [vmem:[%s1995_s0 + $0x7d8] sm:$0xff] }
  0x5c   :  { %597 = vmatpush.msra.mxu1 %v209_v50  ;;  %621 = vmatpush.msra.mxu2 %v224_v51  ;;  %v259_v50 = vld [vmem:[%s1995_s0 + $0x648] sm:$0xff]  ;;  %v276_v51 = vld [vmem:[%s1995_s0 + $0x6d0] sm:$0xff] }
  0x5d   :  { %643 = vmatpush.msra.mxu3 %v241_v52  ;;  %576 = vmatpush.msra.mxu0 %v191_v53  ;;  %v291_v52 = vld [vmem:[%s1995_s0 + $0x748] sm:$0xff]  ;;  %v308_v53 = vld [vmem:[%s1995_s0 + $0x7d0] sm:$0xff] }
  0x5e   :  { %598 = vmatpush.msra.mxu1 %v208_v54  ;;  %622 = vmatpush.msra.mxu2 %v223_v55  ;;  %v258_v54 = vld [vmem:[%s1995_s0 + $0x640] sm:$0xff]  ;;  %v275_v55 = vld [vmem:[%s1995_s0 + $0x6c8] sm:$0xff] }
  0x5f   :  { %644 = vmatpush.msra.mxu3 %v240_v56  ;;  %577 = vmatpush.msra.mxu0 %v190_v57  ;;  %v290_v56 = vld [vmem:[%s1995_s0 + $0x740] sm:$0xff]  ;;  %v307_v57 = vld [vmem:[%s1995_s0 + $0x7c8] sm:$0xff] }
  0x60   :  { %599 = vmatpush.msra.mxu1 %v207_v58  ;;  %623 = vmatpush.msra.mxu2 %v222_v59  ;;  %v257_v58 = vld [vmem:[%s1995_s0 + $0x638] sm:$0xff]  ;;  %v274_v59 = vld [vmem:[%s1995_s0 + $0x6c0] sm:$0xff] }
  0x61   :  { %645 = vmatpush.msra.mxu3 %v239_v60  ;;  %493 = vmatmul.f32.gmra.mxu0 %v43_v61  ;;  %v289_v60 = vld [vmem:[%s1995_s0 + $0x738] sm:$0xff]  ;;  %v306_v61 = vld [vmem:[%s1995_s0 + $0x7c0] sm:$0xff] }
  0x62   :  { %539 = vmatmul.f32.gmra.mxu2 %v45_v62  ;;  %578 = vmatpush.msra.mxu0 %v189_v63  ;;  %v256_v62 = vld [vmem:[%s1995_s0 + $0x630] sm:$0xff]  ;;  %v273_v63 = vld [vmem:[%s1995_s0 + $0x6b8] sm:$0xff] }
  0x63   :  { %600 = vmatpush.msra.mxu1 %v206_v0  ;;  %624 = vmatpush.msra.mxu2 %v221_v1  ;;  %v288_v0 = vld [vmem:[%s1995_s0 + $0x730] sm:$0xff]  ;;  %v305_v1 = vld [vmem:[%s1995_s0 + $0x7b8] sm:$0xff] }
  0x64   :  { %646 = vmatpush.msra.mxu3 %v238_v2  ;;  %516 = vmatmul.f32.gmra.mxu1 %v44_v3  ;;  %v255_v2 = vld [vmem:[%s1995_s0 + $0x628] sm:$0xff]  ;;  %v272_v3 = vld [vmem:[%s1995_s0 + $0x6b0] sm:$0xff] }
  0x65   :  { %562 = vmatmul.f32.gmra.mxu3 %v46_v4  ;;  %579 = vmatpush.msra.mxu0 %v188_v5  ;;  %v287_v4 = vld [vmem:[%s1995_s0 + $0x728] sm:$0xff]  ;;  %v304_v5 = vld [vmem:[%s1995_s0 + $0x7b0] sm:$0xff] }
  0x66   :  { %601 = vmatpush.msra.mxu1 %v205_v6  ;;  %625 = vmatpush.msra.mxu2 %v220_v7  ;;  %v254_v6 = vld [vmem:[%s1995_s0 + $0x620] sm:$0xff]  ;;  %v271_v7 = vld [vmem:[%s1995_s0 + $0x6a8] sm:$0xff] }
  0x67   :  { %647 = vmatpush.msra.mxu3 %v237_v8  ;;  %580 = vmatpush.msra.mxu0 %v187_v9  ;;  %v286_v8 = vld [vmem:[%s1995_s0 + $0x720] sm:$0xff]  ;;  %v303_v9 = vld [vmem:[%s1995_s0 + $0x7a8] sm:$0xff] }
  0x68   :  { %602 = vmatpush.msra.mxu1 %v204_v10  ;;  %626 = vmatpush.msra.mxu2 %v219_v11  ;;  %v253_v10 = vld [vmem:[%s1995_s0 + $0x618] sm:$0xff]  ;;  %v270_v11 = vld [vmem:[%s1995_s0 + $0x6a0] sm:$0xff] }
  0x69   :  { %648 = vmatpush.msra.mxu3 %v236_v12  ;;  %581 = vmatpush.msra.mxu0 %v186_v14  ;;  %v285_v12 = vld [vmem:[%s1995_s0 + $0x718] sm:$0xff]  ;;  %v302_v14 = vld [vmem:[%s1995_s0 + $0x7a0] sm:$0xff] }
  0x6a   :  { %603 = vmatpush.msra.mxu1 %v203_v15  ;;  %627 = vmatpush.msra.mxu2 %v218_v16  ;;  %v252_v15 = vld [vmem:[%s1995_s0 + $0x610] sm:$0xff]  ;;  %v269_v16 = vld [vmem:[%s1995_s0 + $0x698] sm:$0xff] }
  0x6b   :  { %649 = vmatpush.msra.mxu3 %v235_v17  ;;  %582 = vmatmul.f32.vlgmr.msra.gmra.mxu0 %v28_v18  ;;  %v284_v17 = vld [vmem:[%s1995_s0 + $0x710] sm:$0xff]  ;;  %v301_v18 = vld [vmem:[%s1995_s0 + $0x798] sm:$0xff] }
  0x6c   :  { %628 = vmatmul.f32.vlgmr.msra.gmra.mxu2 %v30_v19  ;;  %658 = vmatpush.msrb.mxu0 %v265_v20  ;;  %v251_v19 = vld [vmem:[%s1995_s0 + $0x608] sm:$0xff]  ;;  %v268_v20 = vld [vmem:[%s1995_s0 + $0x690] sm:$0xff] }
  0x6d   :  { %704 = vmatpush.msrb.mxu2 %v297_v21  ;;  %604 = vmatpush.msra.mxu1 %v202_v22  ;;  %v283_v21 = vld [vmem:[%s1995_s0 + $0x708] sm:$0xff]  ;;  %v300_v22 = vld [vmem:[%s1995_s0 + $0x790] sm:$0xff] }
  0x6e   :  { %650 = vmatpush.msra.mxu3 %v234_v23  ;;  %605 = vmatmul.f32.vlgmr.msra.gmra.mxu1 %v29_v24  ;;  %v250_v23 = vld [vmem:[%s1995_s0 + $0x600] sm:$0xff]  ;;  %v267_v24 = vld [vmem:[%s1995_s0 + $0x688] sm:$0xff] }
  0x6f   :  { %651 = vmatmul.f32.vlgmr.msra.gmra.mxu3 %v31_v25  ;;  %659 = vmatpush.msrb.mxu0 %v264_v26  ;;  %v282_v25 = vld [vmem:[%s1995_s0 + $0x700] sm:$0xff]  ;;  %v299_v26 = vld [vmem:[%s1995_s0 + $0x788] sm:$0xff] }
  0x70   :  { %681 = vmatpush.msrb.mxu1 %v281_v27  ;;  %705 = vmatpush.msrb.mxu2 %v296_v28  ;;  %v32_v27 = vld [vmem:[%s1996_s1 + $0x60] sm:$0xff]  ;;  %v34_v28 = vld [vmem:[%s1996_s1 + $0x70] sm:$0xff] }
  0x71   :  { %727 = vmatpush.msrb.mxu3 %v313_v29  ;;  %660 = vmatpush.msrb.mxu0 %v263_v30  ;;  %v329_v29 = vld [vmem:[%s1995_s0 + $0x878] sm:$0xff]  ;;  %v266_v30 = vld [vmem:[%s1995_s0 + $0x680] sm:$0xff] }
  0x72   :  { %682 = vmatpush.msrb.mxu1 %v280_v31  ;;  %706 = vmatpush.msrb.mxu2 %v295_v32  ;;  %v298_v31 = vld [vmem:[%s1995_s0 + $0x780] sm:$0xff]  ;;  %v33_v32 = vld [vmem:[%s1996_s1 + $0x68] sm:$0xff] }
  0x73   :  { %728 = vmatpush.msrb.mxu3 %v312_v33  ;;  %661 = vmatpush.msrb.mxu0 %v262_v34  ;;  %v35_v33 = vld [vmem:[%s1996_s1 + $0x78] sm:$0xff]  ;;  %v328_v34 = vld [vmem:[%s1995_s0 + $0x870] sm:$0xff] }
  0x74   :  { %683 = vmatpush.msrb.mxu1 %v279_v35  ;;  %707 = vmatpush.msrb.mxu2 %v294_v36  ;;  %v345_v35 = vld [vmem:[%s1995_s0 + $0x8f8] sm:$0xff]  ;;  %v358_v36 = vld [vmem:[%s1995_s0 + $0x960] sm:$0x1] }
  0x75   :  { %729 = vmatpush.msrb.mxu3 %v311_v37  ;;  %585 = vmatmul.f32.gmra.mxu0 %v47_v38  ;;  %v327_v37 = vld [vmem:[%s1995_s0 + $0x868] sm:$0xff]  ;;  %v344_v38 = vld [vmem:[%s1995_s0 + $0x8f0] sm:$0xff] }
  0x76   :  { %631 = vmatmul.f32.gmra.mxu2 %v49_v39  ;;  %662 = vmatpush.msrb.mxu0 %v261_v40  ;;  %v357_v39 = vld [vmem:[%s1995_s0 + $0x958] sm:$0xff]  ;;  %v326_v40 = vld [vmem:[%s1995_s0 + $0x860] sm:$0xff] }
  0x77   :  { %684 = vmatpush.msrb.mxu1 %v278_v41  ;;  %708 = vmatpush.msrb.mxu2 %v293_v42  ;;  %v343_v41 = vld [vmem:[%s1995_s0 + $0x8e8] sm:$0xff]  ;;  %v51_v42 = vld [vmem:[%s1996_s1 + $0xf8] sm:$0x3] }
  0x78   :  { %730 = vmatpush.msrb.mxu3 %v310_v43  ;;  %608 = vmatmul.f32.gmra.mxu1 %v48_v44  ;;  %v53_v43 = vld [vmem:[%s1996_s1 + $0x108] sm:$0x3]  ;;  %v325_v44 = vld [vmem:[%s1995_s0 + $0x858] sm:$0xff] }
  0x79   :  { %654 = vmatmul.f32.gmra.mxu3 %v50_v45  ;;  %663 = vmatpush.msrb.mxu0 %v260_v46  ;;  %v342_v45 = vld [vmem:[%s1995_s0 + $0x8e0] sm:$0xff] }
  0x7a   :  { %685 = vmatpush.msrb.mxu1 %v277_v47  ;;  %709 = vmatpush.msrb.mxu2 %v292_v48  ;;  %v52_v46 = vld [vmem:[%s1996_s1 + $0x100] sm:$0x3]  ;;  %v54_v47 = vld [vmem:[%s1996_s1 + $0x110] sm:$0x3] }
  0x7b   :  { %731 = vmatpush.msrb.mxu3 %v309_v49  ;;  %664 = vmatpush.msrb.mxu0 %v259_v50  ;;  %v324_v48 = vld [vmem:[%s1995_s0 + $0x850] sm:$0xff]  ;;  %v341_v49 = vld [vmem:[%s1995_s0 + $0x8d8] sm:$0xff]  ;;  %v355_v50 = vld [vmem:[%s1995_s0 + $0x948] sm:$0xff] }
  0x7c   :  { %686 = vmatpush.msrb.mxu1 %v276_v51  ;;  %710 = vmatpush.msrb.mxu2 %v291_v52  ;;  %v323_v51 = vld [vmem:[%s1995_s0 + $0x848] sm:$0xff]  ;;  %v340_v52 = vld [vmem:[%s1995_s0 + $0x8d0] sm:$0xff] }
  0x7d   :  { %732 = vmatpush.msrb.mxu3 %v308_v53  ;;  %665 = vmatpush.msrb.mxu0 %v258_v54  ;;  %v354_v53 = vld [vmem:[%s1995_s0 + $0x940] sm:$0xff] }
  0x7e   :  { %687 = vmatpush.msrb.mxu1 %v275_v55  ;;  %711 = vmatpush.msrb.mxu2 %v290_v56  ;;  %v322_v54 = vld [vmem:[%s1995_s0 + $0x840] sm:$0xff]  ;;  %v339_v55 = vld [vmem:[%s1995_s0 + $0x8c8] sm:$0xff]  ;;  %v353_v56 = vld [vmem:[%s1995_s0 + $0x938] sm:$0xff] }
  0x7f   :  { %733 = vmatpush.msrb.mxu3 %v307_v57  ;;  %666 = vmatpush.msrb.mxu0 %v257_v58  ;;  %v321_v57 = vld [vmem:[%s1995_s0 + $0x838] sm:$0xff]  ;;  %v338_v58 = vld [vmem:[%s1995_s0 + $0x8c0] sm:$0xff] }
  0x80   :  { %688 = vmatpush.msrb.mxu1 %v274_v59  ;;  %712 = vmatpush.msrb.mxu2 %v289_v60  ;;  %v352_v59 = vld [vmem:[%s1995_s0 + $0x930] sm:$0xff] }
  0x81   :  { %734 = vmatpush.msrb.mxu3 %v306_v61  ;;  %667 = vmatpush.msrb.mxu0 %v256_v62  ;;  %v320_v60 = vld [vmem:[%s1995_s0 + $0x830] sm:$0xff]  ;;  %v337_v61 = vld [vmem:[%s1995_s0 + $0x8b8] sm:$0xff]  ;;  %v351_v62 = vld [vmem:[%s1995_s0 + $0x928] sm:$0xff] }
  0x82   :  { %689 = vmatpush.msrb.mxu1 %v273_v63  ;;  %713 = vmatpush.msrb.mxu2 %v288_v0  ;;  %v319_v63 = vld [vmem:[%s1995_s0 + $0x828] sm:$0xff]  ;;  %v336_v0 = vld [vmem:[%s1995_s0 + $0x8b0] sm:$0xff] }
  0x83   :  { %735 = vmatpush.msrb.mxu3 %v305_v1  ;;  %668 = vmatpush.msrb.mxu0 %v255_v2  ;;  %v350_v1 = vld [vmem:[%s1995_s0 + $0x920] sm:$0xff] }
  0x84   :  { %690 = vmatpush.msrb.mxu1 %v272_v3  ;;  %714 = vmatpush.msrb.mxu2 %v287_v4  ;;  %v318_v2 = vld [vmem:[%s1995_s0 + $0x820] sm:$0xff]  ;;  %v335_v3 = vld [vmem:[%s1995_s0 + $0x8a8] sm:$0xff]  ;;  %v349_v4 = vld [vmem:[%s1995_s0 + $0x918] sm:$0xff] }
  0x85   :  { %736 = vmatpush.msrb.mxu3 %v304_v5  ;;  %669 = vmatpush.msrb.mxu0 %v254_v6  ;;  %v317_v5 = vld [vmem:[%s1995_s0 + $0x818] sm:$0xff]  ;;  %v334_v6 = vld [vmem:[%s1995_s0 + $0x8a0] sm:$0xff] }
  0x86   :  { %691 = vmatpush.msrb.mxu1 %v271_v7  ;;  %715 = vmatpush.msrb.mxu2 %v286_v8  ;;  %v348_v7 = vld [vmem:[%s1995_s0 + $0x910] sm:$0xff] }
  0x87   :  { %737 = vmatpush.msrb.mxu3 %v303_v9  ;;  %670 = vmatpush.msrb.mxu0 %v253_v10  ;;  %v316_v8 = vld [vmem:[%s1995_s0 + $0x810] sm:$0xff]  ;;  %v333_v9 = vld [vmem:[%s1995_s0 + $0x898] sm:$0xff]  ;;  %v347_v10 = vld [vmem:[%s1995_s0 + $0x908] sm:$0xff] }
  0x88   :  { %692 = vmatpush.msrb.mxu1 %v270_v11  ;;  %716 = vmatpush.msrb.mxu2 %v285_v12  ;;  %v315_v11 = vld [vmem:[%s1995_s0 + $0x808] sm:$0xff]  ;;  %v332_v12 = vld [vmem:[%s1995_s0 + $0x890] sm:$0xff] }
  0x89   :  { %738 = vmatpush.msrb.mxu3 %v302_v14  ;;  %671 = vmatpush.msrb.mxu0 %v252_v15  ;;  %v346_v14 = vld [vmem:[%s1995_s0 + $0x900] sm:$0xff]  ;;  %v38_v15 = vld [vmem:[%s1996_s1 + $0x90] sm:$0xff] }
  0x8a   :  { %693 = vmatpush.msrb.mxu1 %v269_v16  ;;  %717 = vmatpush.msrb.mxu2 %v284_v17  ;;  %v314_v16 = vld [vmem:[%s1995_s0 + $0x800] sm:$0xff]  ;;  %v331_v17 = vld [vmem:[%s1995_s0 + $0x888] sm:$0xff] }
  0x8b   :  { %739 = vmatpush.msrb.mxu3 %v301_v18  ;;  %672 = vmatpush.msrb.mxu0 %v251_v19  ;;  %v36_v18 = vld [vmem:[%s1996_s1 + $0x80] sm:$0xff] }
  0x8c   :  { %694 = vmatpush.msrb.mxu1 %v268_v20  ;;  %718 = vmatpush.msrb.mxu2 %v283_v21  ;;  %v330_v19 = vld [vmem:[%s1995_s0 + $0x880] sm:$0xff]  ;;  %v37_v20 = vld [vmem:[%s1996_s1 + $0x88] sm:$0xff] }
  0x8d   :  { %740 = vmatpush.msrb.mxu3 %v300_v22  ;;  %673 = vmatpush.msrb.mxu0 %v250_v23  ;;  %v57_v21 = vld [vmem:[%s1996_s1 + $0x128] sm:$0x3]  ;;  %v55_v22 = vld [vmem:[%s1996_s1 + $0x118] sm:$0x3]  ;;  %v56_v23 = vld [vmem:[%s1996_s1 + $0x120] sm:$0x3] }
  0x8e   :  { %695 = vmatpush.msrb.mxu1 %v267_v24  ;;  %719 = vmatpush.msrb.mxu2 %v282_v25 }
  0x8f   :  { %741 = vmatpush.msrb.mxu3 %v299_v26  ;;  %674 = vmatmul.f32.vlgmr.msrb.gmra.mxu0 %v32_v27 }
  0x90   :  { %720 = vmatmul.f32.vlgmr.msrb.gmra.mxu2 %v34_v28  ;;  %750 = vmatpush.msra.mxu0 %v329_v29 }
  0x91   :  { %696 = vmatpush.msrb.mxu1 %v266_v30  ;;  %742 = vmatpush.msrb.mxu3 %v298_v31 }
  0x92   :  { %697 = vmatmul.f32.vlgmr.msrb.gmra.mxu1 %v33_v32  ;;  %743 = vmatmul.f32.vlgmr.msrb.gmra.mxu3 %v35_v33 }
  0x93   :  { %751 = vmatpush.msra.mxu0 %v328_v34  ;;  %773 = vmatpush.msra.mxu1 %v345_v35 }
  0x94   :  { %901 = vmatpush.msk.msra.mxu2 %vm378_vm0, %v358_v36  ;;  %909 = vset.pattern.permute.xlu1 %v916_v13  ;;  %v356_v13 = vld [vmem:[%s1995_s0 + $0x950] sm:$0xff] }
  0x95   :  { %752 = vmatpush.msra.mxu0 %v327_v37  ;;  %774 = vmatpush.msra.mxu1 %v344_v38 }
  0x96   :  { %800 = vmatpush.msra.mxu2 %v357_v39 }
  0x97   :  { %753 = vmatpush.msra.mxu0 %v326_v40  ;;  %775 = vmatpush.msra.mxu1 %v343_v41 }
  0x98   :  { %677 = vmatmul.f32.gmra.mxu0 %v51_v42  ;;  %723 = vmatmul.f32.gmra.mxu2 %v53_v43 }
  0x99   :  { %754 = vmatpush.msra.mxu0 %v325_v44  ;;  %776 = vmatpush.msra.mxu1 %v342_v45 }
  0x9a   :  { %801 = vmatpush.msra.mxu2 %v356_v13  ;;  %700 = vmatmul.f32.gmra.mxu1 %v52_v46 }
  0x9b   :  { %746 = vmatmul.f32.gmra.mxu3 %v54_v47  ;;  %755 = vmatpush.msra.mxu0 %v324_v48 }
  0x9c   :  { %777 = vmatpush.msra.mxu1 %v341_v49  ;;  %802 = vmatpush.msra.mxu2 %v355_v50 }
  0x9d   :  { %756 = vmatpush.msra.mxu0 %v323_v51 }
  0x9e   :  { %778 = vmatpush.msra.mxu1 %v340_v52  ;;  %803 = vmatpush.msra.mxu2 %v354_v53 }
  0x9f   :  { %757 = vmatpush.msra.mxu0 %v322_v54 }
  0xa0   :  { %779 = vmatpush.msra.mxu1 %v339_v55  ;;  %804 = vmatpush.msra.mxu2 %v353_v56 }
  0xa1   :  { %758 = vmatpush.msra.mxu0 %v321_v57 }
  0xa2   :  { %780 = vmatpush.msra.mxu1 %v338_v58  ;;  %805 = vmatpush.msra.mxu2 %v352_v59 }
  0xa3   :  { %759 = vmatpush.msra.mxu0 %v320_v60 }
  0xa4   :  { %781 = vmatpush.msra.mxu1 %v337_v61  ;;  %806 = vmatpush.msra.mxu2 %v351_v62 }
  0xa5   :  { %760 = vmatpush.msra.mxu0 %v319_v63 }
  0xa6   :  { %782 = vmatpush.msra.mxu1 %v336_v0  ;;  %807 = vmatpush.msra.mxu2 %v350_v1 }
  0xa7   :  { %761 = vmatpush.msra.mxu0 %v318_v2 }
  0xa8   :  { %783 = vmatpush.msra.mxu1 %v335_v3  ;;  %808 = vmatpush.msra.mxu2 %v349_v4 }
  0xa9   :  { %762 = vmatpush.msra.mxu0 %v317_v5 }
  0xaa   :  { %784 = vmatpush.msra.mxu1 %v334_v6  ;;  %809 = vmatpush.msra.mxu2 %v348_v7 }
  0xab   :  { %763 = vmatpush.msra.mxu0 %v316_v8 }
  0xac   :  { %785 = vmatpush.msra.mxu1 %v333_v9  ;;  %810 = vmatpush.msra.mxu2 %v347_v10 }
  0xad   :  { %764 = vmatpush.msra.mxu0 %v315_v11 }
  0xae   :  { %786 = vmatpush.msra.mxu1 %v332_v12  ;;  %811 = vmatpush.msra.mxu2 %v346_v14 }
  0xaf   :  { %902 = vmatmul.msk.f32.vlgmr.msra.gmra.mxu2 %vm371_vm1, %v38_v15  ;;  %765 = vmatpush.msra.mxu0 %v314_v16 }
  0xb0   :  { %787 = vmatpush.msra.mxu1 %v331_v17  ;;  %766 = vmatmul.f32.vlgmr.msra.gmra.mxu0 %v36_v18 }
  0xb2   :  { %788 = vmatpush.msra.mxu1 %v330_v19  ;;  %v824_v19 = vld [vmem:[%s1998_s4 + $0x8] sm:$0x3] }
  0xb3   :  { %789 = vmatmul.f32.vlgmr.msra.gmra.mxu1 %v37_v20  ;;  %832 = vperm.xlu1 %909, %v824_v19  }
  0xb7   :  { %903 = vmatmul.msk.f32.gmra.mxu2 %vm371_vm1, %v57_v21  ;;  %v399_v24 = vpop.f32.mrf.mxu0 }
  0xb8   :  { %769 = vmatmul.f32.gmra.mxu0 %v55_v22 }
  0xba   :  { %v422_v25 = vpop.f32.mrf.mxu1 }
  0xbb   :  { %792 = vmatmul.f32.gmra.mxu1 %v56_v23  ;;  %v445_v26 = vpop.f32.mrf.mxu2 }
  0xbc   :  { %v369_v29 = vpop.permute.xlu0 %368 }
  0xbe   :  { %v468_v28 = vpop.f32.mrf.mxu3 }
  0xc1   :  { %v402_v27 = vpop.f32.mrf.mxu0 }
  0xc2   :  { %v403_v38 = vadd.f32 %v402_v27, %v369_v29 }
  0xc5   :  { %v425_v30 = vpop.f32.mrf.mxu1  ;;  %v448_v31 = vpop.f32.mrf.mxu2 }
  0xc6   :  { %v426_v41 = vadd.f32 %v425_v30, %v403_v38 }
  0xc7   :  { %v364_v34 = vpop.permute.xlu0 %363 }
  0xc8   :  { %v471_v33 = vpop.f32.mrf.mxu3  ;;  %v400_v37 = vadd.f32 %v399_v24, %v364_v34  ;;  %v449_v13 = vadd.f32 %v448_v31, %v426_v41 }
  0xca   :  { %v423_v40 = vadd.f32 %v422_v25, %v400_v37  ;;  %v472_v48 = vadd.f32 %v471_v33, %v449_v13 }
  0xcc   :  { %v491_v32 = vpop.f32.mrf.mxu0  ;;  %v446_v45 = vadd.f32 %v445_v26, %v423_v40  ;;  %v823_v26 = vld [vmem:[%s1998_s4] sm:$0xff] }
  0xcd   :  { %827 = vperm.xlu1 %909, %v823_v26  }
  0xce   :  { %v469_v46 = vadd.f32 %v468_v28, %v446_v45 }
  0xcf   :  { %v514_v35 = vpop.f32.mrf.mxu1 }
  0xd0   :  { %v537_v36 = vpop.f32.mrf.mxu2  ;;  %v492_v51 = vadd.f32 %v491_v32, %v469_v46 }
  0xd2   :  { %v515_v54 = vadd.f32 %v514_v35, %v492_v51 }
  0xd3   :  { %v560_v43 = vpop.f32.mrf.mxu3 }
  0xd4   :  { %v538_v57 = vadd.f32 %v537_v36, %v515_v54 }
  0xd6   :  { %v561_v62 = vadd.f32 %v560_v43, %v538_v57  ;;  %v822_v43 = vld [vmem:[%s1999_s3 + $0x8] sm:$0x3] }
  0xde   :  { %v494_v39 = vpop.f32.mrf.mxu0 }
  0xdf   :  { %v495_v52 = vadd.f32 %v494_v39, %v472_v48 }
  0xe1   :  { %v517_v42 = vpop.f32.mrf.mxu1 }
  0xe2   :  { %v518_v55 = vadd.f32 %v517_v42, %v495_v52  ;;  %v821_v42 = vld [vmem:[%s1999_s3] sm:$0xff] }
  0xe5   :  { %v540_v44 = vpop.f32.mrf.mxu2 }
  0xe6   :  { %v541_v59 = vadd.f32 %v540_v44, %v518_v55 }
  0xe8   :  { %v583_v47 = vpop.f32.mrf.mxu0  ;;  %v563_v49 = vpop.f32.mrf.mxu3 }
  0xe9   :  { %v564_v63 = vadd.f32 %v563_v49, %v541_v59  ;;  %v584_v0 = vadd.f32 %v583_v47, %v561_v62 }
  0xeb   :  { %v606_v50 = vpop.f32.mrf.mxu1 }
  0xec   :  { %v607_v4 = vadd.f32 %v606_v50, %v584_v0 }
  0xef   :  { %v629_v53 = vpop.f32.mrf.mxu2 }
  0xf0   :  { %v630_v7 = vadd.f32 %v629_v53, %v607_v4 }
  0xf2   :  { %v586_v56 = vpop.f32.mrf.mxu0  ;;  %v652_v58 = vpop.f32.mrf.mxu3 }
  0xf3   :  { %v587_v2 = vadd.f32 %v586_v56, %v564_v63  ;;  %v653_v10 = vadd.f32 %v652_v58, %v630_v7 }
  0xf5   :  { %v609_v60 = vpop.f32.mrf.mxu1 }
  0xf6   :  { %v610_v8 = vadd.f32 %v609_v60, %v587_v2 }
  0xf9   :  { %v632_v61 = vpop.f32.mrf.mxu2 }
  0xfa   :  { %v633_v9 = vadd.f32 %v632_v61, %v610_v8 }
  0xfc   :  { %v655_v5 = vpop.f32.mrf.mxu3 }
  0xfd   :  { %v656_v15 = vadd.f32 %v655_v5, %v633_v9 }
 0x10c   :  { %v675_v1 = vpop.f32.mrf.mxu0 }
 0x10d   :  { %v676_v12 = vadd.f32 %v675_v1, %v653_v10 }
 0x10f   :  { %v698_v3 = vpop.f32.mrf.mxu1 }
 0x110   :  { %v699_v20 = vadd.f32 %v698_v3, %v676_v12 }
 0x113   :  { %v721_v6 = vpop.f32.mrf.mxu2 }
 0x114   :  { %v722_v21 = vadd.f32 %v721_v6, %v699_v20 }
 0x115   :  { %v678_v11 = vpop.f32.mrf.mxu0  ;;  %v744_v14 = vpop.f32.mrf.mxu3 }
 0x116   :  { %v679_v17 = vadd.f32 %v678_v11, %v656_v15  ;;  %v745_v27 = vadd.f32 %v744_v14, %v722_v21 }
 0x117   :  { %v701_v16 = vpop.f32.mrf.mxu1 }
 0x118   :  { %v702_v23 = vadd.f32 %v701_v16, %v679_v17 }
 0x11b   :  { %v724_v18 = vpop.f32.mrf.mxu2 }
 0x11c   :  { %v725_v24 = vadd.f32 %v724_v18, %v702_v23 }
 0x11e   :  { %v747_v28 = vpop.f32.mrf.mxu3 }
 0x11f   :  { %v748_v31 = vadd.f32 %v747_v28, %v725_v24 }
 0x125   :  { %v833_v44 = vpop.permute.xlu1 %832 }
 0x12d   :  { %v767_v22 = vpop.f32.mrf.mxu0 }
 0x12e   :  { %v768_v30 = vadd.f32 %v767_v22, %v745_v27 }
 0x130   :  { %v790_v25 = vpop.f32.mrf.mxu1 }
 0x131   :  { %v791_v34 = vadd.f32 %v790_v25, %v768_v30 }
 0x132   :  { %v813_v29 = vpop.f32.mrf.mxu2 }
 0x133   :  { %v814_v38 = vadd.f32 %v813_v29, %v791_v34 }
 0x135   :  { %v770_v32 = vpop.f32.mrf.mxu0  ;;  %v819_v41 = vmax.f32 %v814_v38, 0.0 }
 0x136   :  { %v771_v33 = vadd.f32 %v770_v32, %v748_v31 }
 0x138   :  { %v793_v35 = vpop.f32.mrf.mxu1 }
 0x139   :  { %v794_v36 = vadd.f32 %v793_v35, %v771_v33 }
 0x13a   :  { %v816_v37 = vpop.f32.mrf.mxu2 }
 0x13b   :  { %v817_v39 = vadd.f32 %v816_v37, %v794_v36 }
 0x13d   :  { %v820_v40 = vmax.f32 %v817_v39, 0.0 }
 0x13f   :  { %904 = vmatpush.msk.msra.mxu3 %vm842_vm2, %v820_v40  ;;  %v828_v13 = vpop.permute.xlu1 %827 }
 0x141   :  { %861 = vmatpush.msra.mxu3 %v819_v41 }
 0x142   :  { %905 = vmatmul.msk.f32.vlgmr.msra.gmra.mxu3 %vm835_vm3, %v821_v42 }
 0x14a   :  { %906 = vmatmul.msk.f32.gmra.mxu3 %vm835_vm3, %v822_v43 }
 0x1c5   :  { %v863_v45 = vpop.f32.mrf.mxu3 }
 0x1c6   :  { %v864_v48 = vadd.f32 %v863_v45, %v828_v13 }
 0x1cd   :  { %v866_v46 = vpop.f32.mrf.mxu3 }
 0x1ce   :  { %v867_v47 = vadd.f32 %v866_v46, %v833_v44 }
 0x1d0   :  { %v869_v49 = vsel %vm842_vm2, %v867_v47, -inf }
 0x1d1   :  { %v870_v50 = vmax.f32 %v864_v48, %v869_v49 }
 0x1d3   :  { %v871_v51 = vrot.slane %v870_v50, 4 }
 0x1d5   :  { %v872_v52 = vmax.f32 %v870_v50, %v871_v51 }
 0x1d7   :  { %v873_v53 = vrot.slane %v872_v52, 2 }
 0x1d9   :  { %v874_v54 = vmax.f32 %v872_v52, %v873_v53 }
 0x1db   :  { %v875_v55 = vrot.slane %v874_v54, 1 }
 0x1dd   :  { %v876_v56 = vmax.f32 %v874_v54, %v875_v55 }
 0x1df   :  { %v877_v57 = vsub.f32 %v864_v48, %v876_v56  ;;  %v878_v58 = vsub.f32 %v867_v47, %v876_v56 }
 0x1e1   :  { %v879_v59 = vmul.f32 1.442695, %v877_v57  ;;  %v881_v60 = vmul.f32 1.442695, %v878_v58 }
 0x1e3   :  { %910 = vpow2.f32 %v879_v59 }
 0x1e4   :  { %912 = vpow2.f32 %v881_v60 }
 0x1e9   :  { %v911_v61 = vpop.eup %910 }
 0x1ea   :  { %v913_v62 = vpop.eup %912 }
 0x1eb   :  { %v883_v63 = vsel %vm842_vm2, %v913_v62, 0.0 }
 0x1ec   :  { %v884_v0 = vadd.f32 %v911_v61, %v883_v63 }
 0x1ee   :  { %v885_v1 = vrot.slane %v884_v0, 4 }
 0x1f0   :  { %v886_v2 = vadd.f32 %v885_v1, %v884_v0 }
 0x1f2   :  { %v887_v3 = vrot.slane %v886_v2, 2 }
 0x1f4   :  { %v888_v4 = vadd.f32 %v887_v3, %v886_v2 }
 0x1f6   :  { %v889_v5 = vrot.slane %v888_v4, 1 }
 0x1f8   :  { %v890_v6 = vadd.f32 %v889_v5, %v888_v4 }
 0x1fa   :  { %914 = vlog2.f32 %v890_v6 }
 0x200   :  { %v915_v7 = vpop.eup %914 }
 0x201   :  { %v892_v8 = vmul.f32 0.6931472, %v915_v7 }
 0x203   :  { %v893_v9 = vsub.f32 %v877_v57, %v892_v8  ;;  %v894_v10 = vsub.f32 %v878_v58, %v892_v8 }
 0x205   :  { %895 = vst [vmem:[%s2000_s5] sm:$0xff] %v893_v9 }
 0x206   :  { %896 = vst [vmem:[%s2000_s5 + $0x8] sm:$0x3] %v894_v10 }

</bundles_post_ra>
